<compile_context>
chip_gen: v5e
topology: v5e:2x2
jax: 0.10.0
libtpu: 0.0.40
codegen_flags: <defaults>
</compile_context>

<pallas_src>
import math
import functools

import jax
import jax.numpy as jnp
from jax import lax
from jax.experimental import pallas as pl
from jax.experimental.pallas import tpu as pltpu


_VMEM_LIMIT_BYTES = 48 * 1024 * 1024  # raised scoped-VMEM budget, still below v7x physical 64 MiB


def _layernorm(x, g, b, eps):
    mean = jnp.mean(x, axis=-1, keepdims=True)
    var = jnp.mean((x - mean) ** 2, axis=-1, keepdims=True)
    return (x - mean) * lax.rsqrt(var + eps) * g + b


def _gelu_exact(x):
    # torch.nn.functional.gelu default (erf-based, approximate='none')
    return x * 0.5 * (1.0 + lax.erf(x * (1.0 / math.sqrt(2.0))))


# --------------------- Kernel 1: LN1 + fused QKV projection ---------------------

def qkv_proj_kernel(eps,
                    x_ref, ln1g_ref, ln1b_ref, wqkv_ref, bqkv_ref,
                    q_ref, k_ref, v_ref):
    x = x_ref[0]                                       # (T, E) f32
    E = x.shape[-1]
    h1 = _layernorm(x, ln1g_ref[...], ln1b_ref[...], eps)
    qkv = jnp.dot(h1.astype(jnp.bfloat16), wqkv_ref[...],
                  preferred_element_type=jnp.float32) + bqkv_ref[...]
    q_ref[0] = qkv[:, 0:E]
    k_ref[0] = qkv[:, E:2 * E]                         # kv cache (pre head-split layout)
    v_ref[0] = qkv[:, 2 * E:3 * E]


# ------- Kernel 2: flash attention + out-proj + residual + LN2 + MLP + residual -------

def attn_mlp_kernel(num_heads, head_dim, eps, tq, tk,
                    # inputs
                    x_ref, q_ref, k_ref, v_ref, bias_ref,
                    wo_ref, bo_ref, ln2g_ref, ln2b_ref,
                    wfc_ref, bfc_ref, wproj_ref, bproj_ref,
                    # outputs
                    out_ref,
                    # scratch (persist across the kv grid axis)
                    m_scr, l_scr, acc_scr):
    qi = pl.program_id(1)
    ki = pl.program_id(2)

    @pl.when(ki == 0)
    def _init():
        m_scr[...] = jnp.full(m_scr.shape, -jnp.inf, m_scr.dtype)
        l_scr[...] = jnp.zeros(l_scr.shape, l_scr.dtype)
        acc_scr[...] = jnp.zeros(acc_scr.shape, acc_scr.dtype)

    # Skip kv tiles lying entirely above the causal diagonal.
    @pl.when(ki * tk <= qi * tq + (tq - 1))
    def _compute():
        scale = 1.0 / math.sqrt(head_dim)
        q3 = (q_ref[0] * scale).astype(jnp.bfloat16)    # (H, TQ, hd)
        k3 = k_ref[0].astype(jnp.bfloat16)              # (H, TK, hd)
        v3 = v_ref[0].astype(jnp.bfloat16)              # (H, TK, hd)

        # batched over heads on the MXU, f32 accumulation
        s = jnp.einsum('hqd,hkd->hqk', q3, k3,
                       preferred_element_type=jnp.float32)      # (H, TQ, TK)
        s = s + bias_ref[...][None, :, :]               # module's additive attention bias
        row = qi * tq + lax.broadcasted_iota(jnp.int32, (tq, tk), 0)
        col = ki * tk + lax.broadcasted_iota(jnp.int32, (tq, tk), 1)
        s = jnp.where((row >= col)[None, :, :], s, -1e9)

        m_prev = m_scr[...]
        m_new = jnp.maximum(m_prev, jnp.max(s, axis=-1, keepdims=True))
        alpha = jnp.exp(m_prev - m_new)
        p = jnp.exp(s - m_new)
        l_scr[...] = alpha * l_scr[...] + jnp.sum(p, axis=-1, keepdims=True)
        acc_scr[...] = alpha * acc_scr[...] + jnp.einsum(
            'hqk,hkd->hqd', p.astype(jnp.bfloat16), v3,
            preferred_element_type=jnp.float32)
        m_scr[...] = m_new

    @pl.when(ki == pl.num_programs(2) - 1)
    def _finalize():
        # normalize (EUP approx reciprocal) and merge heads lane-dense -> (TQ, E)
        ctx = acc_scr[...] * pl.reciprocal(l_scr[...], approx=True)   # (H, TQ, hd) f32
        ctx = jnp.concatenate([ctx[h] for h in range(num_heads)], axis=-1)

        attn_out = jnp.dot(ctx.astype(jnp.bfloat16), wo_ref[...],
                           preferred_element_type=jnp.float32) + bo_ref[...]
        x1 = x_ref[0] + attn_out                        # residual 1 (dropout == identity)

        h2 = _layernorm(x1, ln2g_ref[...], ln2b_ref[...], eps)
        ff = jnp.dot(h2.astype(jnp.bfloat16), wfc_ref[...],
                     preferred_element_type=jnp.float32) + bfc_ref[...]
        ff = _gelu_exact(ff)
        ff = jnp.dot(ff.astype(jnp.bfloat16), wproj_ref[...],
                     preferred_element_type=jnp.float32) + bproj_ref[...]
        out_ref[0] = x1 + ff                            # residual 2 (dropout == identity)


# -------------------------------- wrapper --------------------------------

def _pick_seq_tile(s):
    for t in (256, 128):
        if s >= t and s % t == 0:
            return t
    return s


def prefill_block(x, params, *, num_heads, eps):
    B, S, E = x.shape
    I = params["wfc_t"].shape[1]
    head_dim = E // num_heads
    T = _pick_seq_tile(S)
    nT = S // T
    f32 = jnp.float32
    bf16 = jnp.bfloat16

    # bf16 weights (halves VMEM footprint; matmuls accumulate in f32)
    wqkv = params["wqkv_t"].astype(bf16)
    wo = params["wo_t"].astype(bf16)
    wfc = params["wfc_t"].astype(bf16)
    wproj = params["wproj_t"].astype(bf16)
    bias_ss = params["attn_bias"][:S, :S].astype(f32)   # additive attention bias, sliced to seq

    # ---- kernel 1: LN1 + QKV projection (also yields the kv cache) ----
    def rep2(shape):
        nd = len(shape)
        return pl.BlockSpec(shape, lambda b, t, _nd=nd: (0,) * _nd)

    act2 = pl.BlockSpec((1, T, E), lambda b, t: (b, t, 0))
    q, k_cache, v_cache = pl.pallas_call(
        functools.partial(qkv_proj_kernel, eps),
        grid=(B, nT),
        in_specs=[act2,
                  rep2((1, E)), rep2((1, E)),            # ln1 gamma, beta
                  rep2((E, 3 * E)), rep2((1, 3 * E))],   # c_attn weight^T (bf16), bias
        out_specs=(act2, act2, act2),
        out_shape=(jax.ShapeDtypeStruct((B, S, E), f32),
                   jax.ShapeDtypeStruct((B, S, E), f32),
                   jax.ShapeDtypeStruct((B, S, E), f32)),
        compiler_params=pltpu.CompilerParams(
            dimension_semantics=("parallel", "parallel"),
            vmem_limit_bytes=_VMEM_LIMIT_BYTES),
    )(x, params["ln1_g"], params["ln1_b"], wqkv, params["bqkv"])

    # head split/transpose in plain XLA (layout plumbing, mirrors view().transpose(1,2))
    def to_heads(t):
        return jnp.transpose(t.reshape(B, S, num_heads, head_dim), (0, 2, 1, 3))

    qh, kh, vh = to_heads(q), to_heads(k_cache), to_heads(v_cache)

    # ---- kernel 2: flash attention + out-proj + LN2 + MLP ----
    def rep3(shape):
        nd = len(shape)
        return pl.BlockSpec(shape, lambda b, qi, ki, _nd=nd: (0,) * _nd)

    x_spec = pl.BlockSpec((1, T, E), lambda b, qi, ki: (b, qi, 0))
    qh_spec = pl.BlockSpec((1, num_heads, T, head_dim), lambda b, qi, ki: (b, 0, qi, 0))
    kh_spec = pl.BlockSpec((1, num_heads, T, head_dim), lambda b, qi, ki: (b, 0, ki, 0))
    bias_spec = pl.BlockSpec((T, T), lambda b, qi, ki: (qi, ki))

    out = pl.pallas_call(
        functools.partial(attn_mlp_kernel, num_heads, head_dim, eps, T, T),
        grid=(B, nT, nT),
        in_specs=[x_spec,                                # x (residual)
                  qh_spec, kh_spec, kh_spec,             # q, k, v (head-major)
                  bias_spec,                             # additive attention bias tile
                  rep3((E, E)), rep3((1, E)),            # attn c_proj weight^T (bf16), bias
                  rep3((1, E)), rep3((1, E)),            # ln2 gamma, beta
                  rep3((E, I)), rep3((1, I)),            # mlp c_fc weight^T (bf16), bias
                  rep3((I, E)), rep3((1, E))],           # mlp c_proj weight^T (bf16), bias
        out_specs=x_spec,
        out_shape=jax.ShapeDtypeStruct((B, S, E), f32),
        scratch_shapes=[pltpu.VMEM((num_heads, T, 1), f32),          # running max
                        pltpu.VMEM((num_heads, T, 1), f32),          # running sum
                        pltpu.VMEM((num_heads, T, head_dim), f32)],  # context accumulator
        compiler_params=pltpu.CompilerParams(
            dimension_semantics=("parallel", "parallel", "arbitrary"),
            vmem_limit_bytes=_VMEM_LIMIT_BYTES),
    )(x, qh, kh, vh, bias_ss,
      wo, params["bo"], params["ln2_g"], params["ln2_b"],
      wfc, params["bfc"], wproj, params["bproj"])

    return out, k_cache, v_cache


def reference_block(x, params, *, num_heads, eps):
    """Pure-JAX reference mirroring the PyTorch forward (eval mode)."""
    B, S, E = x.shape
    hd = E // num_heads

    def ln(v, g, b):
        m = v.mean(-1, keepdims=True)
        var = ((v - m) ** 2).mean(-1, keepdims=True)
        return (v - m) / jnp.sqrt(var + eps) * g + b

    h1 = ln(x, params["ln1_g"][0], params["ln1_b"][0])
    qkv = h1 @ params["wqkv_t"] + params["bqkv"][0]
    q, k, v = jnp.split(qkv, 3, axis=-1)
    kv = (k, v)

    def heads(t):
        return t.reshape(B, S, num_heads, hd).transpose(0, 2, 1, 3)

    qh, kh, vh = heads(q), heads(k), heads(v)
    scores = qh @ kh.transpose(0, 1, 3, 2) / math.sqrt(hd)
    scores = scores + params["attn_bias"][:S, :S][None, None]
    mask = jnp.tril(jnp.ones((S, S), jnp.float32))
    scores = jnp.where(mask == 0, -1e9, scores)
    w = jax.nn.softmax(scores, axis=-1)
    ctx = (w @ vh).transpose(0, 2, 1, 3).reshape(B, S, E)
    attn = ctx @ params["wo_t"] + params["bo"][0]
    x1 = x + attn
    h2 = ln(x1, params["ln2_g"][0], params["ln2_b"][0])
    ff = h2 @ params["wfc_t"] + params["bfc"][0]
    ff = jax.nn.gelu(ff, approximate=False)
    ff = ff @ params["wproj_t"] + params["bproj"][0]
    return x1 + ff, kv


if __name__ == "__main__":
    # Small GPT-2-like config
    B, S = 2, 8
    E = 32                 # n_embd
    H = 4                  # num_attention_heads
    N_CTX = 8              # n_ctx (== seq for prefill here)
    INNER = 4 * E          # n_inner (None -> 4 * n_embd)
    EPS = 1e-5             # layer_norm_epsilon

    key = jax.random.PRNGKey(0)
    ks = jax.random.split(key, 16)

    def rnd(k, shape, scale=0.02):
        return (scale * jax.random.normal(k, shape)).astype(jnp.float32)

    params = {
        "ln1_g": 1.0 + rnd(ks[0], (1, E)),
        "ln1_b": rnd(ks[1], (1, E)),
        "wqkv_t": rnd(ks[2], (E, 3 * E)),      # c_attn weight (already transposed)
        "bqkv": rnd(ks[3], (1, 3 * E)),
        # h.L.attn.bias buffer (n_ctx, n_ctx) — used additively in the forward
        "attn_bias": jnp.tril(jnp.ones((N_CTX, N_CTX), jnp.float32)),
        "wo_t": rnd(ks[4], (E, E)),            # attn c_proj
        "bo": rnd(ks[5], (1, E)),
        "ln2_g": 1.0 + rnd(ks[6], (1, E)),
        "ln2_b": rnd(ks[7], (1, E)),
        "wfc_t": rnd(ks[8], (E, INNER)),       # mlp c_fc: E -> INNER
        "bfc": rnd(ks[9], (1, INNER)),
        "wproj_t": rnd(ks[10], (INNER, E)),    # mlp c_proj: INNER -> E
        "bproj": rnd(ks[11], (1, E)),
    }

    x = jax.random.normal(ks[12], (B, S, E), dtype=jnp.float32)

    run = jax.jit(functools.partial(prefill_block, num_heads=H, eps=EPS))
    out, k_cache, v_cache = run(x, params)
    out = jax.block_until_ready(out)
    k_cache = jax.block_until_ready(k_cache)
    v_cache = jax.block_until_ready(v_cache)

    ref_out, (ref_k, ref_v) = reference_block(x, params, num_heads=H, eps=EPS)
    assert jnp.allclose(out, ref_out, atol=3e-3, rtol=3e-3), "block output mismatch"
    assert jnp.allclose(k_cache, ref_k, atol=3e-3, rtol=3e-3), "key cache mismatch"
    assert jnp.allclose(v_cache, ref_v, atol=3e-3, rtol=3e-3), "value cache mismatch"

    print("KERNEL_OK")
</pallas_src>

<mosaic_0001>
module attributes {stable_mosaic.version = 11 : i64} {
  func.func @qkv_proj_kernel(%arg0: i32, %arg1: i32, %arg2: memref<1x8x32xf32, #tpu.memory_space<vmem>>, %arg3: memref<1x32xf32, #tpu.memory_space<vmem>>, %arg4: memref<1x32xf32, #tpu.memory_space<vmem>>, %arg5: memref<32x96xbf16, #tpu.memory_space<vmem>>, %arg6: memref<1x96xf32, #tpu.memory_space<vmem>>, %arg7: memref<1x8x32xf32, #tpu.memory_space<vmem>>, %arg8: memref<1x8x32xf32, #tpu.memory_space<vmem>>, %arg9: memref<1x8x32xf32, #tpu.memory_space<vmem>>) attributes {dimension_semantics = [#tpu.dimension_semantics<parallel>, #tpu.dimension_semantics<parallel>], iteration_bounds = array<i64: 2, 1>, scalar_prefetch = 0 : i64, scratch_operands = 0 : i64, tpu.core_type = #tpu.core_type<tc>, window_params = [{transform_indices = @transform_0, window_bounds = array<i64: 1, 8, 32>}, {pipeline_mode = #tpu.pipeline_mode<synchronous>, transform_indices = @transform_1, window_bounds = array<i64: 1, 32>}, {pipeline_mode = #tpu.pipeline_mode<synchronous>, transform_indices = @transform_2, window_bounds = array<i64: 1, 32>}, {pipeline_mode = #tpu.pipeline_mode<synchronous>, transform_indices = @transform_3, window_bounds = array<i64: 32, 96>}, {pipeline_mode = #tpu.pipeline_mode<synchronous>, transform_indices = @transform_4, window_bounds = array<i64: 1, 96>}, {transform_indices = @transform_5, window_bounds = array<i64: 1, 8, 32>}, {transform_indices = @transform_6, window_bounds = array<i64: 1, 8, 32>}, {transform_indices = @transform_7, window_bounds = array<i64: 1, 8, 32>}]} {
    %c0 = arith.constant 0 : index
    %c0_0 = arith.constant 0 : index
    %c0_1 = arith.constant 0 : index
    %0 = vector.load %arg2[%c0, %c0_0, %c0_1] : memref<1x8x32xf32, #tpu.memory_space<vmem>>, vector<1x8x32xf32>
    %1 = vector.shape_cast %0 : vector<1x8x32xf32> to vector<8x32xf32>
    %c0_2 = arith.constant 0 : index
    %c0_3 = arith.constant 0 : index
    %2 = vector.load %arg3[%c0_2, %c0_3] : memref<1x32xf32, #tpu.memory_space<vmem>>, vector<1x32xf32>
    %c0_4 = arith.constant 0 : index
    %c0_5 = arith.constant 0 : index
    %3 = vector.load %arg4[%c0_4, %c0_5] : memref<1x32xf32, #tpu.memory_space<vmem>>, vector<1x32xf32>
    %cst = arith.constant dense<0.000000e+00> : vector<8xf32>
    %4 = vector.multi_reduction <add>, %1, %cst [1] : vector<8x32xf32> to vector<8xf32>
    %5 = vector.shape_cast %4 : vector<8xf32> to vector<8x1xf32>
    %cst_6 = arith.constant 3.200000e+01 : f32
    %6 = vector.broadcast %cst_6 : f32 to vector<8x1xf32>
    %7 = arith.divf %5, %6 : vector<8x1xf32>
    %8 = vector.broadcast %7 : vector<8x1xf32> to vector<8x32xf32>
    %9 = arith.subf %1, %8 : vector<8x32xf32>
    %10 = arith.mulf %9, %9 : vector<8x32xf32>
    %cst_7 = arith.constant dense<0.000000e+00> : vector<8xf32>
    %11 = vector.multi_reduction <add>, %10, %cst_7 [1] : vector<8x32xf32> to vector<8xf32>
    %12 = vector.shape_cast %11 : vector<8xf32> to vector<8x1xf32>
    %cst_8 = arith.constant 3.200000e+01 : f32
    %13 = vector.broadcast %cst_8 : f32 to vector<8x1xf32>
    %14 = arith.divf %12, %13 : vector<8x1xf32>
    %15 = vector.broadcast %7 : vector<8x1xf32> to vector<8x32xf32>
    %16 = arith.subf %1, %15 : vector<8x32xf32>
    %cst_9 = arith.constant 9.99999974E-6 : f32
    %17 = vector.broadcast %cst_9 : f32 to vector<8x1xf32>
    %18 = arith.addf %14, %17 : vector<8x1xf32>
    %19 = math.rsqrt %18 : vector<8x1xf32>
    %20 = vector.broadcast %19 : vector<8x1xf32> to vector<8x32xf32>
    %21 = arith.mulf %16, %20 : vector<8x32xf32>
    %22 = vector.broadcast %2 : vector<1x32xf32> to vector<8x32xf32>
    %23 = arith.mulf %21, %22 : vector<8x32xf32>
    %24 = vector.broadcast %3 : vector<1x32xf32> to vector<8x32xf32>
    %25 = arith.addf %23, %24 : vector<8x32xf32>
    %26 = arith.truncf %25 : vector<8x32xf32> to vector<8x32xbf16>
    %c0_10 = arith.constant 0 : index
    %c0_11 = arith.constant 0 : index
    %27 = vector.load %arg5[%c0_10, %c0_11] : memref<32x96xbf16, #tpu.memory_space<vmem>>, vector<32x96xbf16>
    %cst_12 = arith.constant dense<0.000000e+00> : vector<8x96xf32>
    %28 = tpu.matmul %26, %27, %cst_12 {dimension_numbers = #tpu.dot_dimension_numbers<[1], [0], [0], [1], [0, 0, 1, 1], [], []>} : vector<8x32xbf16>, vector<32x96xbf16>, vector<8x96xf32> -> vector<8x96xf32>
    %c0_13 = arith.constant 0 : index
    %c0_14 = arith.constant 0 : index
    %29 = vector.load %arg6[%c0_13, %c0_14] : memref<1x96xf32, #tpu.memory_space<vmem>>, vector<1x96xf32>
    %30 = vector.broadcast %29 : vector<1x96xf32> to vector<8x96xf32>
    %31 = arith.addf %28, %30 : vector<8x96xf32>
    %32 = vector.extract_strided_slice %31 {offsets = [0, 0], sizes = [8, 32], strides = [1, 1]} : vector<8x96xf32> to vector<8x32xf32>
    %c0_15 = arith.constant 0 : index
    %c0_16 = arith.constant 0 : index
    %c0_17 = arith.constant 0 : index
    %33 = vector.load %arg7[%c0_15, %c0_16, %c0_17] : memref<1x8x32xf32, #tpu.memory_space<vmem>>, vector<1x8x32xf32>
    %34 = vector.shape_cast %33 : vector<1x8x32xf32> to vector<8x32xf32>
    %35 = vector.shape_cast %32 : vector<8x32xf32> to vector<1x8x32xf32>
    tpu.vector_store %arg7[%c0_15, %c0_16, %c0_17], %35 {strides = array<i32>} : memref<1x8x32xf32, #tpu.memory_space<vmem>>, vector<1x8x32xf32>,
    %36 = vector.extract_strided_slice %31 {offsets = [0, 32], sizes = [8, 32], strides = [1, 1]} : vector<8x96xf32> to vector<8x32xf32>
    %c0_18 = arith.constant 0 : index
    %c0_19 = arith.constant 0 : index
    %c0_20 = arith.constant 0 : index
    %37 = vector.load %arg8[%c0_18, %c0_19, %c0_20] : memref<1x8x32xf32, #tpu.memory_space<vmem>>, vector<1x8x32xf32>
    %38 = vector.shape_cast %37 : vector<1x8x32xf32> to vector<8x32xf32>
    %39 = vector.shape_cast %36 : vector<8x32xf32> to vector<1x8x32xf32>
    tpu.vector_store %arg8[%c0_18, %c0_19, %c0_20], %39 {strides = array<i32>} : memref<1x8x32xf32, #tpu.memory_space<vmem>>, vector<1x8x32xf32>,
    %40 = vector.extract_strided_slice %31 {offsets = [0, 64], sizes = [8, 32], strides = [1, 1]} : vector<8x96xf32> to vector<8x32xf32>
    %c0_21 = arith.constant 0 : index
    %c0_22 = arith.constant 0 : index
    %c0_23 = arith.constant 0 : index
    %41 = vector.load %arg9[%c0_21, %c0_22, %c0_23] : memref<1x8x32xf32, #tpu.memory_space<vmem>>, vector<1x8x32xf32>
    %42 = vector.shape_cast %41 : vector<1x8x32xf32> to vector<8x32xf32>
    %43 = vector.shape_cast %40 : vector<8x32xf32> to vector<1x8x32xf32>
    tpu.vector_store %arg9[%c0_21, %c0_22, %c0_23], %43 {strides = array<i32>} : memref<1x8x32xf32, #tpu.memory_space<vmem>>, vector<1x8x32xf32>,
    return
  }
  func.func @transform_0(%arg0: i32, %arg1: i32) -> (i32, i32, i32) {
    %c0_i32 = arith.constant 0 : i32
    %c0_i32_0 = arith.constant 0 : i32
    return %arg0, %arg1, %c0_i32 : i32, i32, i32
  }
  func.func @transform_1(%arg0: i32, %arg1: i32) -> (i32, i32) {
    %c0_i32 = arith.constant 0 : i32
    %c0_i32_0 = arith.constant 0 : i32
    %c0_i32_1 = arith.constant 0 : i32
    return %c0_i32, %c0_i32_0 : i32, i32
  }
  func.func @transform_2(%arg0: i32, %arg1: i32) -> (i32, i32) {
    %c0_i32 = arith.constant 0 : i32
    %c0_i32_0 = arith.constant 0 : i32
    %c0_i32_1 = arith.constant 0 : i32
    return %c0_i32, %c0_i32_0 : i32, i32
  }
  func.func @transform_3(%arg0: i32, %arg1: i32) -> (i32, i32) {
    %c0_i32 = arith.constant 0 : i32
    %c0_i32_0 = arith.constant 0 : i32
    %c0_i32_1 = arith.constant 0 : i32
    return %c0_i32, %c0_i32_0 : i32, i32
  }
  func.func @transform_4(%arg0: i32, %arg1: i32) -> (i32, i32) {
    %c0_i32 = arith.constant 0 : i32
    %c0_i32_0 = arith.constant 0 : i32
    %c0_i32_1 = arith.constant 0 : i32
    return %c0_i32, %c0_i32_0 : i32, i32
  }
  func.func @transform_5(%arg0: i32, %arg1: i32) -> (i32, i32, i32) {
    %c0_i32 = arith.constant 0 : i32
    %c0_i32_0 = arith.constant 0 : i32
    return %arg0, %arg1, %c0_i32 : i32, i32, i32
  }
  func.func @transform_6(%arg0: i32, %arg1: i32) -> (i32, i32, i32) {
    %c0_i32 = arith.constant 0 : i32
    %c0_i32_0 = arith.constant 0 : i32
    return %arg0, %arg1, %c0_i32 : i32, i32, i32
  }
  func.func @transform_7(%arg0: i32, %arg1: i32) -> (i32, i32, i32) {
    %c0_i32 = arith.constant 0 : i32
    %c0_i32_0 = arith.constant 0 : i32
    return %arg0, %arg1, %c0_i32 : i32, i32, i32
  }
}

module attributes {stable_mosaic.version = 11 : i64} {
  func.func @attn_mlp_kernel(%arg0: i32, %arg1: i32, %arg2: i32, %arg3: memref<1x8x32xf32, #tpu.memory_space<vmem>>, %arg4: memref<1x4x8x8xf32, #tpu.memory_space<vmem>>, %arg5: memref<1x4x8x8xf32, #tpu.memory_space<vmem>>, %arg6: memref<1x4x8x8xf32, #tpu.memory_space<vmem>>, %arg7: memref<8x8xf32, #tpu.memory_space<vmem>>, %arg8: memref<32x32xbf16, #tpu.memory_space<vmem>>, %arg9: memref<1x32xf32, #tpu.memory_space<vmem>>, %arg10: memref<1x32xf32, #tpu.memory_space<vmem>>, %arg11: memref<1x32xf32, #tpu.memory_space<vmem>>, %arg12: memref<32x128xbf16, #tpu.memory_space<vmem>>, %arg13: memref<1x128xf32, #tpu.memory_space<vmem>>, %arg14: memref<128x32xbf16, #tpu.memory_space<vmem>>, %arg15: memref<1x32xf32, #tpu.memory_space<vmem>>, %arg16: memref<1x8x32xf32, #tpu.memory_space<vmem>>, %arg17: memref<4x8x1xf32, #tpu.memory_space<vmem>>, %arg18: memref<4x8x1xf32, #tpu.memory_space<vmem>>, %arg19: memref<4x8x8xf32, #tpu.memory_space<vmem>>) attributes {dimension_semantics = [#tpu.dimension_semantics<parallel>, #tpu.dimension_semantics<parallel>, #tpu.dimension_semantics<arbitrary>], iteration_bounds = array<i64: 2, 1, 1>, scalar_prefetch = 0 : i64, scratch_operands = 3 : i64, tpu.core_type = #tpu.core_type<tc>, window_params = [{transform_indices = @transform_0, window_bounds = array<i64: 1, 8, 32>}, {transform_indices = @transform_1, window_bounds = array<i64: 1, 4, 8, 8>}, {transform_indices = @transform_2, window_bounds = array<i64: 1, 4, 8, 8>}, {transform_indices = @transform_3, window_bounds = array<i64: 1, 4, 8, 8>}, {transform_indices = @transform_4, window_bounds = array<i64: 8, 8>}, {pipeline_mode = #tpu.pipeline_mode<synchronous>, transform_indices = @transform_5, window_bounds = array<i64: 32, 32>}, {pipeline_mode = #tpu.pipeline_mode<synchronous>, transform_indices = @transform_6, window_bounds = array<i64: 1, 32>}, {pipeline_mode = #tpu.pipeline_mode<synchronous>, transform_indices = @transform_7, window_bounds = array<i64: 1, 32>}, {pipeline_mode = #tpu.pipeline_mode<synchronous>, transform_indices = @transform_8, window_bounds = array<i64: 1, 32>}, {pipeline_mode = #tpu.pipeline_mode<synchronous>, transform_indices = @transform_9, window_bounds = array<i64: 32, 128>}, {pipeline_mode = #tpu.pipeline_mode<synchronous>, transform_indices = @transform_10, window_bounds = array<i64: 1, 128>}, {pipeline_mode = #tpu.pipeline_mode<synchronous>, transform_indices = @transform_11, window_bounds = array<i64: 128, 32>}, {pipeline_mode = #tpu.pipeline_mode<synchronous>, transform_indices = @transform_12, window_bounds = array<i64: 1, 32>}, {transform_indices = @transform_13, window_bounds = array<i64: 1, 8, 32>}]} {
    %c0_i32 = arith.constant 0 : i32
    %0 = arith.cmpi eq, %arg2, %c0_i32 : i32
    %1 = arith.extui %0 : i1 to i32
    %c0_i32_0 = arith.constant 0 : i32
    %2 = arith.cmpi ne, %1, %c0_i32_0 : i32
    scf.if %2 {
      %cst = arith.constant 0xFF800000 : f32
      %12 = vector.broadcast %cst : f32 to vector<4x8x1xf32>
      %c0 = arith.constant 0 : index
      %c0_5 = arith.constant 0 : index
      %c0_6 = arith.constant 0 : index
      %13 = vector.load %arg17[%c0, %c0_5, %c0_6] : memref<4x8x1xf32, #tpu.memory_space<vmem>>, vector<4x8x1xf32>
      tpu.vector_store %arg17[%c0, %c0_5, %c0_6], %12 {strides = array<i32>} : memref<4x8x1xf32, #tpu.memory_space<vmem>>, vector<4x8x1xf32>,
      %cst_7 = arith.constant 0.000000e+00 : f32
      %14 = vector.broadcast %cst_7 : f32 to vector<4x8x1xf32>
      %c0_8 = arith.constant 0 : index
      %c0_9 = arith.constant 0 : index
      %c0_10 = arith.constant 0 : index
      %15 = vector.load %arg18[%c0_8, %c0_9, %c0_10] : memref<4x8x1xf32, #tpu.memory_space<vmem>>, vector<4x8x1xf32>
      tpu.vector_store %arg18[%c0_8, %c0_9, %c0_10], %14 {strides = array<i32>} : memref<4x8x1xf32, #tpu.memory_space<vmem>>, vector<4x8x1xf32>,
      %cst_11 = arith.constant 0.000000e+00 : f32
      %16 = vector.broadcast %cst_11 : f32 to vector<4x8x8xf32>
      %c0_12 = arith.constant 0 : index
      %c0_13 = arith.constant 0 : index
      %c0_14 = arith.constant 0 : index
      %17 = vector.load %arg19[%c0_12, %c0_13, %c0_14] : memref<4x8x8xf32, #tpu.memory_space<vmem>>, vector<4x8x8xf32>
      tpu.vector_store %arg19[%c0_12, %c0_13, %c0_14], %16 {strides = array<i32>} : memref<4x8x8xf32, #tpu.memory_space<vmem>>, vector<4x8x8xf32>,
    } else {
    }
    %c8_i32 = arith.constant 8 : i32
    %3 = arith.muli %arg2, %c8_i32 : i32
    %c8_i32_1 = arith.constant 8 : i32
    %4 = arith.muli %arg1, %c8_i32_1 : i32
    %c7_i32 = arith.constant 7 : i32
    %5 = arith.addi %4, %c7_i32 : i32
    %6 = arith.cmpi sle, %3, %5 : i32
    %7 = arith.extui %6 : i1 to i32
    %c0_i32_2 = arith.constant 0 : i32
    %8 = arith.cmpi ne, %7, %c0_i32_2 : i32
    scf.if %8 {
      %c0 = arith.constant 0 : index
      %c0_5 = arith.constant 0 : index
      %c0_6 = arith.constant 0 : index
      %c0_7 = arith.constant 0 : index
      %12 = vector.load %arg4[%c0, %c0_5, %c0_6, %c0_7] : memref<1x4x8x8xf32, #tpu.memory_space<vmem>>, vector<1x4x8x8xf32>
      %13 = vector.shape_cast %12 : vector<1x4x8x8xf32> to vector<4x8x8xf32>
      %cst = arith.constant 0.353553385 : f32
      %14 = vector.broadcast %cst : f32 to vector<4x8x8xf32>
      %15 = arith.mulf %13, %14 : vector<4x8x8xf32>
      %16 = arith.truncf %15 : vector<4x8x8xf32> to vector<4x8x8xbf16>
      %c0_8 = arith.constant 0 : index
      %c0_9 = arith.constant 0 : index
      %c0_10 = arith.constant 0 : index
      %c0_11 = arith.constant 0 : index
      %17 = vector.load %arg5[%c0_8, %c0_9, %c0_10, %c0_11] : memref<1x4x8x8xf32, #tpu.memory_space<vmem>>, vector<1x4x8x8xf32>
      %18 = vector.shape_cast %17 : vector<1x4x8x8xf32> to vector<4x8x8xf32>
      %19 = arith.truncf %18 : vector<4x8x8xf32> to vector<4x8x8xbf16>
      %c0_12 = arith.constant 0 : index
      %c0_13 = arith.constant 0 : index
      %c0_14 = arith.constant 0 : index
      %c0_15 = arith.constant 0 : index
      %20 = vector.load %arg6[%c0_12, %c0_13, %c0_14, %c0_15] : memref<1x4x8x8xf32, #tpu.memory_space<vmem>>, vector<1x4x8x8xf32>
      %21 = vector.shape_cast %20 : vector<1x4x8x8xf32> to vector<4x8x8xf32>
      %22 = arith.truncf %21 : vector<4x8x8xf32> to vector<4x8x8xbf16>
      "tpu.trace_start"() <{level = 10 : i32, message = "hqd,hkd->hqk"}> : () -> ()
      %cst_16 = arith.constant dense<0.000000e+00> : vector<4x8x8xf32>
      %23 = tpu.matmul %16, %19, %cst_16 {dimension_numbers = #tpu.dot_dimension_numbers<[2], [2], [1], [1], [0, 0, 0, 1, 1, 1], [0], [0]>} : vector<4x8x8xbf16>, vector<4x8x8xbf16>, vector<4x8x8xf32> -> vector<4x8x8xf32>
      "tpu.trace_stop"() : () -> ()
      %c0_17 = arith.constant 0 : index
      %c0_18 = arith.constant 0 : index
      %24 = vector.load %arg7[%c0_17, %c0_18] : memref<8x8xf32, #tpu.memory_space<vmem>>, vector<8x8xf32>
      %25 = vector.shape_cast %24 : vector<8x8xf32> to vector<1x8x8xf32>
      %26 = vector.broadcast %25 : vector<1x8x8xf32> to vector<4x8x8xf32>
      %27 = arith.addf %23, %26 : vector<4x8x8xf32>
      %c8_i32_19 = arith.constant 8 : i32
      %28 = arith.muli %arg1, %c8_i32_19 : i32
      %29 = tpu.iota {dimensions = array<i32: 0>} : vector<8x8xi32>
      %30 = vector.broadcast %28 : i32 to vector<8x8xi32>
      %31 = arith.addi %30, %29 : vector<8x8xi32>
      %c8_i32_20 = arith.constant 8 : i32
      %32 = arith.muli %arg2, %c8_i32_20 : i32
      %33 = tpu.iota {dimensions = array<i32: 1>} : vector<8x8xi32>
      %34 = vector.broadcast %32 : i32 to vector<8x8xi32>
      %35 = arith.addi %34, %33 : vector<8x8xi32>
      %36 = arith.cmpi sge, %31, %35 : vector<8x8xi32>
      %37 = vector.shape_cast %36 : vector<8x8xi1> to vector<1x8x8xi1>
      %cst_21 = arith.constant -1.000000e+09 : f32
      %38 = vector.shape_cast %37 : vector<1x8x8xi1> to vector<1x8x8xi1>
      %39 = vector.broadcast %38 : vector<1x8x8xi1> to vector<4x8x8xi1>
      %40 = vector.broadcast %cst_21 : f32 to vector<4x8x8xf32>
      %41 = arith.select %39, %27, %40 : vector<4x8x8xi1>, vector<4x8x8xf32>
      %c0_22 = arith.constant 0 : index
      %c0_23 = arith.constant 0 : index
      %c0_24 = arith.constant 0 : index
      %42 = vector.load %arg17[%c0_22, %c0_23, %c0_24] : memref<4x8x1xf32, #tpu.memory_space<vmem>>, vector<4x8x1xf32>
      %cst_25 = arith.constant dense<0xFF800000> : vector<4x8xf32>
      %43 = vector.multi_reduction <maximumf>, %41, %cst_25 [2] : vector<4x8x8xf32> to vector<4x8xf32>
      %44 = vector.shape_cast %43 : vector<4x8xf32> to vector<4x8x1xf32>
      %45 = arith.maximumf %42, %44 : vector<4x8x1xf32>
      %46 = arith.subf %42, %45 : vector<4x8x1xf32>
      %47 = math.exp %46 : vector<4x8x1xf32>
      %48 = vector.broadcast %45 : vector<4x8x1xf32> to vector<4x8x8xf32>
      %49 = arith.subf %41, %48 : vector<4x8x8xf32>
      %50 = math.exp %49 : vector<4x8x8xf32>
      %c0_26 = arith.constant 0 : index
      %c0_27 = arith.constant 0 : index
      %c0_28 = arith.constant 0 : index
      %51 = vector.load %arg18[%c0_26, %c0_27, %c0_28] : memref<4x8x1xf32, #tpu.memory_space<vmem>>, vector<4x8x1xf32>
      %52 = arith.mulf %47, %51 : vector<4x8x1xf32>
      %cst_29 = arith.constant dense<0.000000e+00> : vector<4x8xf32>
      %53 = vector.multi_reduction <add>, %50, %cst_29 [2] : vector<4x8x8xf32> to vector<4x8xf32>
      %54 = vector.shape_cast %53 : vector<4x8xf32> to vector<4x8x1xf32>
      %55 = arith.addf %52, %54 : vector<4x8x1xf32>
      %c0_30 = arith.constant 0 : index
      %c0_31 = arith.constant 0 : index
      %c0_32 = arith.constant 0 : index
      %56 = vector.load %arg18[%c0_30, %c0_31, %c0_32] : memref<4x8x1xf32, #tpu.memory_space<vmem>>, vector<4x8x1xf32>
      tpu.vector_store %arg18[%c0_30, %c0_31, %c0_32], %55 {strides = array<i32>} : memref<4x8x1xf32, #tpu.memory_space<vmem>>, vector<4x8x1xf32>,
      %c0_33 = arith.constant 0 : index
      %c0_34 = arith.constant 0 : index
      %c0_35 = arith.constant 0 : index
      %57 = vector.load %arg19[%c0_33, %c0_34, %c0_35] : memref<4x8x8xf32, #tpu.memory_space<vmem>>, vector<4x8x8xf32>
      %58 = vector.broadcast %47 : vector<4x8x1xf32> to vector<4x8x8xf32>
      %59 = arith.mulf %58, %57 : vector<4x8x8xf32>
      %60 = arith.truncf %50 : vector<4x8x8xf32> to vector<4x8x8xbf16>
      "tpu.trace_start"() <{level = 10 : i32, message = "hqk,hkd->hqd"}> : () -> ()
      %cst_36 = arith.constant dense<0.000000e+00> : vector<4x8x8xf32>
      %61 = tpu.matmul %60, %22, %cst_36 {dimension_numbers = #tpu.dot_dimension_numbers<[2], [1], [1], [2], [0, 0, 0, 1, 1, 2], [0], [0]>} : vector<4x8x8xbf16>, vector<4x8x8xbf16>, vector<4x8x8xf32> -> vector<4x8x8xf32>
      "tpu.trace_stop"() : () -> ()
      %62 = arith.addf %59, %61 : vector<4x8x8xf32>
      %c0_37 = arith.constant 0 : index
      %c0_38 = arith.constant 0 : index
      %c0_39 = arith.constant 0 : index
      %63 = vector.load %arg19[%c0_37, %c0_38, %c0_39] : memref<4x8x8xf32, #tpu.memory_space<vmem>>, vector<4x8x8xf32>
      tpu.vector_store %arg19[%c0_37, %c0_38, %c0_39], %62 {strides = array<i32>} : memref<4x8x8xf32, #tpu.memory_space<vmem>>, vector<4x8x8xf32>,
      %c0_40 = arith.constant 0 : index
      %c0_41 = arith.constant 0 : index
      %c0_42 = arith.constant 0 : index
      %64 = vector.load %arg17[%c0_40, %c0_41, %c0_42] : memref<4x8x1xf32, #tpu.memory_space<vmem>>, vector<4x8x1xf32>
      tpu.vector_store %arg17[%c0_40, %c0_41, %c0_42], %45 {strides = array<i32>} : memref<4x8x1xf32, #tpu.memory_space<vmem>>, vector<4x8x1xf32>,
    } else {
    }
    %c0_i32_3 = arith.constant 0 : i32
    %9 = arith.cmpi eq, %arg2, %c0_i32_3 : i32
    %10 = arith.extui %9 : i1 to i32
    %c0_i32_4 = arith.constant 0 : i32
    %11 = arith.cmpi ne, %10, %c0_i32_4 : i32
    scf.if %11 {
      %c0 = arith.constant 0 : index
      %c0_5 = arith.constant 0 : index
      %c0_6 = arith.constant 0 : index
      %12 = vector.load %arg19[%c0, %c0_5, %c0_6] : memref<4x8x8xf32, #tpu.memory_space<vmem>>, vector<4x8x8xf32>
      %c0_7 = arith.constant 0 : index
      %c0_8 = arith.constant 0 : index
      %c0_9 = arith.constant 0 : index
      %13 = vector.load %arg18[%c0_7, %c0_8, %c0_9] : memref<4x8x1xf32, #tpu.memory_space<vmem>>, vector<4x8x1xf32>
      %14 = tpu.reciprocal %13 {approx = true} : vector<4x8x1xf32> -> vector<4x8x1xf32>
      %15 = vector.broadcast %14 : vector<4x8x1xf32> to vector<4x8x8xf32>
      %16 = arith.mulf %12, %15 : vector<4x8x8xf32>
      %17 = vector.extract_strided_slice %16 {offsets = [0, 0, 0], sizes = [1, 8, 8], strides = [1, 1, 1]} : vector<4x8x8xf32> to vector<1x8x8xf32>
      %18 = vector.shape_cast %17 : vector<1x8x8xf32> to vector<8x8xf32>
      %19 = vector.extract_strided_slice %16 {offsets = [1, 0, 0], sizes = [1, 8, 8], strides = [1, 1, 1]} : vector<4x8x8xf32> to vector<1x8x8xf32>
      %20 = vector.shape_cast %19 : vector<1x8x8xf32> to vector<8x8xf32>
      %21 = vector.extract_strided_slice %16 {offsets = [2, 0, 0], sizes = [1, 8, 8], strides = [1, 1, 1]} : vector<4x8x8xf32> to vector<1x8x8xf32>
      %22 = vector.shape_cast %21 : vector<1x8x8xf32> to vector<8x8xf32>
      %23 = vector.extract_strided_slice %16 {offsets = [3, 0, 0], sizes = [1, 8, 8], strides = [1, 1, 1]} : vector<4x8x8xf32> to vector<1x8x8xf32>
      %24 = vector.shape_cast %23 : vector<1x8x8xf32> to vector<8x8xf32>
      %25 = tpu.concatenate %18, %20, %22, %24 in 1 : vector<8x8xf32>, vector<8x8xf32>, vector<8x8xf32>, vector<8x8xf32> -> vector<8x32xf32>
      %26 = arith.truncf %25 : vector<8x32xf32> to vector<8x32xbf16>
      %c0_10 = arith.constant 0 : index
      %c0_11 = arith.constant 0 : index
      %27 = vector.load %arg8[%c0_10, %c0_11] : memref<32x32xbf16, #tpu.memory_space<vmem>>, vector<32x32xbf16>
      %cst = arith.constant dense<0.000000e+00> : vector<8x32xf32>
      %28 = tpu.matmul %26, %27, %cst {dimension_numbers = #tpu.dot_dimension_numbers<[1], [0], [0], [1], [0, 0, 1, 1], [], []>} : vector<8x32xbf16>, vector<32x32xbf16>, vector<8x32xf32> -> vector<8x32xf32>
      %c0_12 = arith.constant 0 : index
      %c0_13 = arith.constant 0 : index
      %29 = vector.load %arg9[%c0_12, %c0_13] : memref<1x32xf32, #tpu.memory_space<vmem>>, vector<1x32xf32>
      %30 = vector.broadcast %29 : vector<1x32xf32> to vector<8x32xf32>
      %31 = arith.addf %28, %30 : vector<8x32xf32>
      %c0_14 = arith.constant 0 : index
      %c0_15 = arith.constant 0 : index
      %c0_16 = arith.constant 0 : index
      %32 = vector.load %arg3[%c0_14, %c0_15, %c0_16] : memref<1x8x32xf32, #tpu.memory_space<vmem>>, vector<1x8x32xf32>
      %33 = vector.shape_cast %32 : vector<1x8x32xf32> to vector<8x32xf32>
      %34 = arith.addf %33, %31 : vector<8x32xf32>
      %c0_17 = arith.constant 0 : index
      %c0_18 = arith.constant 0 : index
      %35 = vector.load %arg10[%c0_17, %c0_18] : memref<1x32xf32, #tpu.memory_space<vmem>>, vector<1x32xf32>
      %c0_19 = arith.constant 0 : index
      %c0_20 = arith.constant 0 : index
      %36 = vector.load %arg11[%c0_19, %c0_20] : memref<1x32xf32, #tpu.memory_space<vmem>>, vector<1x32xf32>
      %cst_21 = arith.constant dense<0.000000e+00> : vector<8xf32>
      %37 = vector.multi_reduction <add>, %34, %cst_21 [1] : vector<8x32xf32> to vector<8xf32>
      %38 = vector.shape_cast %37 : vector<8xf32> to vector<8x1xf32>
      %cst_22 = arith.constant 3.200000e+01 : f32
      %39 = vector.broadcast %cst_22 : f32 to vector<8x1xf32>
      %40 = arith.divf %38, %39 : vector<8x1xf32>
      %41 = vector.broadcast %40 : vector<8x1xf32> to vector<8x32xf32>
      %42 = arith.subf %34, %41 : vector<8x32xf32>
      %43 = arith.mulf %42, %42 : vector<8x32xf32>
      %cst_23 = arith.constant dense<0.000000e+00> : vector<8xf32>
      %44 = vector.multi_reduction <add>, %43, %cst_23 [1] : vector<8x32xf32> to vector<8xf32>
      %45 = vector.shape_cast %44 : vector<8xf32> to vector<8x1xf32>
      %cst_24 = arith.constant 3.200000e+01 : f32
      %46 = vector.broadcast %cst_24 : f32 to vector<8x1xf32>
      %47 = arith.divf %45, %46 : vector<8x1xf32>
      %48 = vector.broadcast %40 : vector<8x1xf32> to vector<8x32xf32>
      %49 = arith.subf %34, %48 : vector<8x32xf32>
      %cst_25 = arith.constant 9.99999974E-6 : f32
      %50 = vector.broadcast %cst_25 : f32 to vector<8x1xf32>
      %51 = arith.addf %47, %50 : vector<8x1xf32>
      %52 = math.rsqrt %51 : vector<8x1xf32>
      %53 = vector.broadcast %52 : vector<8x1xf32> to vector<8x32xf32>
      %54 = arith.mulf %49, %53 : vector<8x32xf32>
      %55 = vector.broadcast %35 : vector<1x32xf32> to vector<8x32xf32>
      %56 = arith.mulf %54, %55 : vector<8x32xf32>
      %57 = vector.broadcast %36 : vector<1x32xf32> to vector<8x32xf32>
      %58 = arith.addf %56, %57 : vector<8x32xf32>
      %59 = arith.truncf %58 : vector<8x32xf32> to vector<8x32xbf16>
      %c0_26 = arith.constant 0 : index
      %c0_27 = arith.constant 0 : index
      %60 = vector.load %arg12[%c0_26, %c0_27] : memref<32x128xbf16, #tpu.memory_space<vmem>>, vector<32x128xbf16>
      %cst_28 = arith.constant dense<0.000000e+00> : vector<8x128xf32>
      %61 = tpu.matmul %59, %60, %cst_28 {dimension_numbers = #tpu.dot_dimension_numbers<[1], [0], [0], [1], [0, 0, 1, 1], [], []>} : vector<8x32xbf16>, vector<32x128xbf16>, vector<8x128xf32> -> vector<8x128xf32>
      %c0_29 = arith.constant 0 : index
      %c0_30 = arith.constant 0 : index
      %62 = vector.load %arg13[%c0_29, %c0_30] : memref<1x128xf32, #tpu.memory_space<vmem>>, vector<1x128xf32>
      %63 = vector.broadcast %62 : vector<1x128xf32> to vector<8x128xf32>
      %64 = arith.addf %61, %63 : vector<8x128xf32>
      %cst_31 = arith.constant 5.000000e-01 : f32
      %65 = vector.broadcast %cst_31 : f32 to vector<8x128xf32>
      %66 = arith.mulf %64, %65 : vector<8x128xf32>
      %cst_32 = arith.constant 0.707106769 : f32
      %67 = vector.broadcast %cst_32 : f32 to vector<8x128xf32>
      %68 = arith.mulf %64, %67 : vector<8x128xf32>
      %69 = math.erf %68 : vector<8x128xf32>
      %cst_33 = arith.constant 1.000000e+00 : f32
      %70 = vector.broadcast %cst_33 : f32 to vector<8x128xf32>
      %71 = arith.addf %70, %69 : vector<8x128xf32>
      %72 = arith.mulf %66, %71 : vector<8x128xf32>
      %73 = arith.truncf %72 : vector<8x128xf32> to vector<8x128xbf16>
      %c0_34 = arith.constant 0 : index
      %c0_35 = arith.constant 0 : index
      %74 = vector.load %arg14[%c0_34, %c0_35] : memref<128x32xbf16, #tpu.memory_space<vmem>>, vector<128x32xbf16>
      %cst_36 = arith.constant dense<0.000000e+00> : vector<8x32xf32>
      %75 = tpu.matmul %73, %74, %cst_36 {dimension_numbers = #tpu.dot_dimension_numbers<[1], [0], [0], [1], [0, 0, 1, 1], [], []>} : vector<8x128xbf16>, vector<128x32xbf16>, vector<8x32xf32> -> vector<8x32xf32>
      %c0_37 = arith.constant 0 : index
      %c0_38 = arith.constant 0 : index
      %76 = vector.load %arg15[%c0_37, %c0_38] : memref<1x32xf32, #tpu.memory_space<vmem>>, vector<1x32xf32>
      %77 = vector.broadcast %76 : vector<1x32xf32> to vector<8x32xf32>
      %78 = arith.addf %75, %77 : vector<8x32xf32>
      %79 = arith.addf %34, %78 : vector<8x32xf32>
      %c0_39 = arith.constant 0 : index
      %c0_40 = arith.constant 0 : index
      %c0_41 = arith.constant 0 : index
      %80 = vector.load %arg16[%c0_39, %c0_40, %c0_41] : memref<1x8x32xf32, #tpu.memory_space<vmem>>, vector<1x8x32xf32>
      %81 = vector.shape_cast %80 : vector<1x8x32xf32> to vector<8x32xf32>
      %82 = vector.shape_cast %79 : vector<8x32xf32> to vector<1x8x32xf32>
      tpu.vector_store %arg16[%c0_39, %c0_40, %c0_41], %82 {strides = array<i32>} : memref<1x8x32xf32, #tpu.memory_space<vmem>>, vector<1x8x32xf32>,
    } else {
    }
    return
  }
  func.func @transform_0(%arg0: i32, %arg1: i32, %arg2: i32) -> (i32, i32, i32) {
    %c0_i32 = arith.constant 0 : i32
    %c0_i32_0 = arith.constant 0 : i32
    return %arg0, %arg1, %c0_i32 : i32, i32, i32
  }
  func.func @transform_1(%arg0: i32, %arg1: i32, %arg2: i32) -> (i32, i32, i32, i32) {
    %c0_i32 = arith.constant 0 : i32
    %c0_i32_0 = arith.constant 0 : i32
    %c0_i32_1 = arith.constant 0 : i32
    return %arg0, %c0_i32, %arg1, %c0_i32_0 : i32, i32, i32, i32
  }
  func.func @transform_2(%arg0: i32, %arg1: i32, %arg2: i32) -> (i32, i32, i32, i32) {
    %c0_i32 = arith.constant 0 : i32
    %c0_i32_0 = arith.constant 0 : i32
    %c0_i32_1 = arith.constant 0 : i32
    return %arg0, %c0_i32, %arg2, %c0_i32_0 : i32, i32, i32, i32
  }
  func.func @transform_3(%arg0: i32, %arg1: i32, %arg2: i32) -> (i32, i32, i32, i32) {
    %c0_i32 = arith.constant 0 : i32
    %c0_i32_0 = arith.constant 0 : i32
    %c0_i32_1 = arith.constant 0 : i32
    return %arg0, %c0_i32, %arg2, %c0_i32_0 : i32, i32, i32, i32
  }
  func.func @transform_4(%arg0: i32, %arg1: i32, %arg2: i32) -> (i32, i32) {
    %c0_i32 = arith.constant 0 : i32
    return %arg1, %arg2 : i32, i32
  }
  func.func @transform_5(%arg0: i32, %arg1: i32, %arg2: i32) -> (i32, i32) {
    %c0_i32 = arith.constant 0 : i32
    %c0_i32_0 = arith.constant 0 : i32
    %c0_i32_1 = arith.constant 0 : i32
    return %c0_i32, %c0_i32_0 : i32, i32
  }
  func.func @transform_6(%arg0: i32, %arg1: i32, %arg2: i32) -> (i32, i32) {
    %c0_i32 = arith.constant 0 : i32
    %c0_i32_0 = arith.constant 0 : i32
    %c0_i32_1 = arith.constant 0 : i32
    return %c0_i32, %c0_i32_0 : i32, i32
  }
  func.func @transform_7(%arg0: i32, %arg1: i32, %arg2: i32) -> (i32, i32) {
    %c0_i32 = arith.constant 0 : i32
    %c0_i32_0 = arith.constant 0 : i32
    %c0_i32_1 = arith.constant 0 : i32
    return %c0_i32, %c0_i32_0 : i32, i32
  }
  func.func @transform_8(%arg0: i32, %arg1: i32, %arg2: i32) -> (i32, i32) {
    %c0_i32 = arith.constant 0 : i32
    %c0_i32_0 = arith.constant 0 : i32
    %c0_i32_1 = arith.constant 0 : i32
    return %c0_i32, %c0_i32_0 : i32, i32
  }
  func.func @transform_9(%arg0: i32, %arg1: i32, %arg2: i32) -> (i32, i32) {
    %c0_i32 = arith.constant 0 : i32
    %c0_i32_0 = arith.constant 0 : i32
    %c0_i32_1 = arith.constant 0 : i32
    return %c0_i32, %c0_i32_0 : i32, i32
  }
  func.func @transform_10(%arg0: i32, %arg1: i32, %arg2: i32) -> (i32, i32) {
    %c0_i32 = arith.constant 0 : i32
    %c0_i32_0 = arith.constant 0 : i32
    %c0_i32_1 = arith.constant 0 : i32
    return %c0_i32, %c0_i32_0 : i32, i32
  }
  func.func @transform_11(%arg0: i32, %arg1: i32, %arg2: i32) -> (i32, i32) {
    %c0_i32 = arith.constant 0 : i32
    %c0_i32_0 = arith.constant 0 : i32
    %c0_i32_1 = arith.constant 0 : i32
    return %c0_i32, %c0_i32_0 : i32, i32
  }
  func.func @transform_12(%arg0: i32, %arg1: i32, %arg2: i32) -> (i32, i32) {
    %c0_i32 = arith.constant 0 : i32
    %c0_i32_0 = arith.constant 0 : i32
    %c0_i32_1 = arith.constant 0 : i32
    return %c0_i32, %c0_i32_0 : i32, i32
  }
  func.func @transform_13(%arg0: i32, %arg1: i32, %arg2: i32) -> (i32, i32, i32) {
    %c0_i32 = arith.constant 0 : i32
    %c0_i32_0 = arith.constant 0 : i32
    return %arg0, %arg1, %c0_i32 : i32, i32, i32
  }
}

</mosaic_0001>

<bundles_post_ra>
// kernel: prefill_block.2
= control target key start
LH: loop header
LB: loop body
LE: loop exit
PB: predicated region body
PF: predicated region fallthrough
CT: control target
= control target key end

     0   :  { %s710_s24 = smov 0   ;;  %s712_s25 = smov 0   ;;  %s776_s0 = inlined_call_operand.vmem [shape: f32[2,8,32], index: 0, kind: input, shape index: {}]   ;;  %s777_s1 = inlined_call_operand.vmem [shape: f32[1,32], index: 1, kind: input, shape index: {}]   ;;  %s778_s2 = inlined_call_operand.vmem [shape: f32[1,32], index: 2, kind: input, shape index: {}]   ;;  %s779_s3 = inlined_call_operand.vmem [shape: bf16[32,96], index: 3, kind: input, shape index: {}]   ;;  %s780_s4 = inlined_call_operand.vmem [shape: f32[1,96], index: 4, kind: input, shape index: {}]   ;;  %s781_s5 = inlined_call_operand.vmem [shape: f32[2,8,32], index: 5, kind: output, shape index: {0}]   ;;  %s782_s6 = inlined_call_operand.vmem [shape: f32[2,8,32], index: 6, kind: output, shape index: {1}]   ;;  %s783_s7 = inlined_call_operand.vmem [shape: f32[2,8,32], index: 7, kind: output, shape index: {2}]  }
   0x1   :  { %s714_s26 = smov 0  }
   0x2 LB: > { %s30_s27 = sadd.s32 1, %s661_s25  ;;  %p591_p0 = scmp.ge.s32.totalorder %s665_s26, 1  ;;  %s665_s26 = sphi %s714_s26, %s18_s26   ;;  %s661_s25 = sphi %s712_s25, %s785_s25   ;;  %s657_s24 = sphi %s710_s24, %s784_s24  }
   0x3   : > { %p32_p1 = scmp.ge.s32.totalorder %s30_s27, 2  ;;  %p264_p2 = scmp.lt.s32.totalorder %s665_s26, 3 }
   0x5   : > { %s787_s27 = smov (%p32_p1, %s30_s27), 0  ;;  %p265_p3 = pnand %p591_p0, %p264_p2 }
   0x6   : > { %p314_p4 = scmp.lt.s32.totalorder (!%p265_p3), %s657_s24, 1  ;;  %s668_s22 = smov (!%p265_p3), 96  }
   0x7   : > { %268 = sbr.rel (%p265_p3) target bundleno = 538 (0x21a), region = 40  ;;  %s669_s23 = smov (!%p265_p3), 64  }
   0xc   : > { %s789_s24 = smov (!%p314_p4, %s657_s24), 1  ;;  %vm346_vm0 = vcmask 261120   ;;  %v667_v2 = vmov 32.0   ;;  %v608_v14 = vld [vmem:[%s779_s3 + $0x8] sm:$0xff]  ;;  %v607_v15 = vld [vmem:[%s779_s3] sm:$0xff] }
   0xd   : > { %s728_s28 = sshll.u32 %s789_s24, 3  ;;  %639 = vrcp.f32 %v667_v2  ;;  %414 = vmatpush.bf16.msra.mxu0 %v608_v14  ;;  %v636_v25 = vld [vmem:[%s777_s1] ss:$0 sm:$0xff] }
   0xe   : > { %s320_s8 = scalar_lea.vmem %s776_s0, %s728_s28  ;;  %v637_v28 = vld [vmem:[%s778_s2] ss:$0 sm:$0xff]  ;;  %s327_s21 = scalar_lea.vmem %s781_s5, %s728_s28 }
   0xf   : > { %v343_v0 = vld [vmem:[%s320_s8] sm:$0xff]  ;;  %s334_s30 = scalar_lea.vmem %s782_s6, %s728_s28  ;;  %s341_s10 = scalar_lea.vmem %s783_s7, %s728_s28 }
  0x10   : > { %v347_v1 = vsel %vm346_vm0, %v343_v0, 0.0  ;;  %v638_v32 = vld [vmem:[%s780_s4] ss:$0 sm:$0xff] }
  0x11   : > { %348 = vadd.xlane.f32.xlu0 %v347_v1  ;;  %415 = vmatpush.bf16.msra.mxu0 %v607_v15 }
  0x13   : > { %v640_v3 = vpop.eup %639 }
  0x14   : > { %v351_v4 = vmul.f32 32.0, %v640_v3  ;;  %vm355_vm1 = vweird.f32 %v640_v3 }
  0x16   : > { %v352_v5 = vsub.f32 1.0, %v351_v4 }
  0x18   : > { %v353_v6 = vmul.f32 %v640_v3, %v352_v5 }
  0x1a   : > { %v354_v7 = vadd.f32 %v640_v3, %v353_v6 }
  0x1c   : > { %v356_v8 = vsel %vm355_vm1, %v640_v3, %v354_v7 }
  0x84   : > { %v349_v9 = vpop.xlane.xlu0 %348 }
  0x85   : > { %v357_v10 = vmul.f32 %v356_v8, %v349_v9 }
  0x87   : > { %v358_v11 = vsub.f32 %v343_v0, %v357_v10 }
  0x89   : > { %v359_v12 = vmul.f32 %v358_v11, %v358_v11 }
  0x8b   : > { %v360_v13 = vsel %vm346_vm0, %v359_v12, 0.0 }
  0x8c   : > { %361 = vadd.xlane.f32.xlu0 %v360_v13 }
  0xff   : > { %v362_v16 = vpop.xlane.xlu0 %361 }
 0x100   : > { %v363_v17 = vmul.f32 %v362_v16, %v356_v8 }
 0x102   : > { %v364_v18 = vadd.f32 1e-05, %v363_v17 }
 0x104   : > { %641 = vrsqrt.f32 %v364_v18  ;;  %vm371_vm3 = vweird.f32 %v364_v18 }
 0x10a   : > { %v642_v19 = vpop.eup %641 }
 0x10b   : > { %v366_v20 = vmul.f32 %v642_v19, %v364_v18  ;;  %vm372_vm2 = vweird.f32 %v642_v19 }
 0x10c   : > { %vm373_vm4 = vmor %vm371_vm3, %vm372_vm2 }
 0x10d   : > { %v367_v21 = vmul.f32 %v642_v19, %v366_v20 }
 0x10f   : > { %v368_v22 = vmul.f32 0.5, %v367_v21 }
 0x111   : > { %v369_v23 = vsub.f32 1.5, %v368_v22 }
 0x113   : > { %v370_v24 = vmul.f32 %v642_v19, %v369_v23 }
 0x115   : > { %v374_v26 = vsel %vm373_vm4, %v642_v19, %v370_v24 }
 0x116   : > { %v375_v27 = vmul.f32 %v374_v26, %v358_v11 }
 0x118   : > { %v379_v29 = vmul.f32 %v636_v25, %v375_v27 }
 0x11a   : > { %v383_v30 = vadd.f32 %v637_v28, %v379_v29 }
 0x11c   : > { %v384_v31 = vpack.c.bf16 %v383_v30, %v383_v30 }
 0x11e   : > { %604 = vmatmul.msk.bf16.vlgmr.msra.gmra.mxu0 %vm346_vm0, %v384_v31 }
 0x19b   : > { %v417_v33 = vpop.f32.mrf.mxu0 }
 0x19c   : > { %v418_v34 = vadd.f32 %v638_v32, %v417_v33 }
 0x19e   : > { %421 = vst.msk [vmem:[%s327_s21] sm:$0xff] %vm346_vm0, %v418_v34  ;;  %423 = vrot.lane.b32.xlu1 %v418_v34, %s668_s22 }
 0x1a3   : > { %v419_v35 = vpop.f32.mrf.mxu0 }
 0x1a6   : > { %427 = vrot.lane.b32.xlu1 %v418_v34, %s669_s23 }
 0x210   : > { %v424_v36 = vpop.permute.xlu1 %423 }
 0x211   : > { %426 = vst.msk [vmem:[%s334_s30] sm:$0xff] %vm346_vm0, %v424_v36 }
 0x218   : > { %v428_v37 = vpop.permute.xlu1 %427 }
 0x219   : > { %430 = vst.msk [vmem:[%s341_s10] sm:$0xff] %vm346_vm0, %v428_v37 }
 0x21a PF: > { %s18_s26 = sadd.s32 1, %s665_s26   ;;  %s784_s24 = smov %s661_s25 }
 0x21b   : > { %p15_p5 = scmp.ge.s32.totalorder %s18_s26, 4   ;;  %s785_s25 = smov %s787_s27 }
 0x21d   :  { %17 = sbr.rel (!%p15_p5) target bundleno = 2 (0x2), region = 94 }

// kernel: prefill_block.3
= control target key start
LH: loop header
LB: loop body
LE: loop exit
PB: predicated region body
PF: predicated region fallthrough
CT: control target
= control target key end

     0   :  { %s2075_s0 = inlined_call_operand.vmem [shape: f32[2,8,32], index: 0, kind: input, shape index: {}]   ;;  %s2076_s1 = inlined_call_operand.vmem [shape: f32[2,4,8,8], index: 1, kind: input, shape index: {}]   ;;  %s2077_s2 = inlined_call_operand.vmem [shape: f32[2,4,8,8], index: 2, kind: input, shape index: {}]   ;;  %s2078_s3 = inlined_call_operand.vmem [shape: f32[2,4,8,8], index: 3, kind: input, shape index: {}]   ;;  %s2079_s4 = inlined_call_operand.vmem [shape: f32[8,8], index: 4, kind: input, shape index: {}]   ;;  %s2080_s5 = inlined_call_operand.vmem [shape: bf16[32,32], index: 5, kind: input, shape index: {}]   ;;  %s2081_s6 = inlined_call_operand.vmem [shape: f32[1,32], index: 6, kind: input, shape index: {}]   ;;  %s2082_s7 = inlined_call_operand.vmem [shape: f32[1,32], index: 7, kind: input, shape index: {}]   ;;  %s2083_s8 = inlined_call_operand.vmem [shape: f32[1,32], index: 8, kind: input, shape index: {}]   ;;  %s2084_s9 = inlined_call_operand.vmem [shape: bf16[32,128], index: 9, kind: input, shape index: {}]   ;;  %s2085_s10 = inlined_call_operand.vmem [shape: f32[1,128], index: 10, kind: input, shape index: {}]   ;;  %s2086_s11 = inlined_call_operand.vmem [shape: bf16[128,32], index: 11, kind: input, shape index: {}]   ;;  %s2087_s12 = inlined_call_operand.vmem [shape: f32[1,32], index: 12, kind: input, shape index: {}]   ;;  %s2088_s13 = inlined_call_operand.hbm [shape: f32[2,8,32], index: 13, kind: output, shape index: {}]  }
   0x1   :  { %2090 = sst [smem:[#allocation9_spill]] %s2075_s0 }
   0x2   :  { %2091 = sst [smem:[#allocation10_spill]] %s2076_s1 }
   0x3   :  { %2092 = sst [smem:[#allocation11_spill]] %s2077_s2 }
   0x4   :  { %2093 = sst [smem:[#allocation12_spill]] %s2078_s3 }
   0x5   :  { %18 = vsyncpa [#allocation6], 0 }
   0x6   :  { %20 = vsyncpa [#allocation6 + $0x1], 0  ;;  %s1763_s25 = smov 0   ;;  %s1765_s26 = smov 0  }
   0x7   :  { %s1767_s27 = smov 0   ;;  %s1769_s28 = smov 0  }
   0x8   :  { %s1771_s29 = smov 0   ;;  %s1773_s30 = smov 0  }
   0x9 LB: > { %s1414_s14 = sadd.s32 4294967295, %s1684_s30   ;;  %s1415_s15 = sadd.s32 4294967294, %s1684_s30   ;;  %s1684_s30 = sphi %s1773_s30, %s26_s30   ;;  %s1680_s29 = sphi %s1771_s29, %s2106_s29   ;;  %s1676_s28 = sphi %s1769_s28, %s2105_s28   ;;  %s1672_s27 = sphi %s1767_s27, %s2104_s27   ;;  %s1668_s26 = sphi %s1765_s26, %s2103_s26   ;;  %s1664_s25 = sphi %s1763_s25, %s2102_s25  }
   0xa   : > { %s45_s16 = sadd.s32 1, %s1680_s29  ;;  %s362_s17 = sadd.s32 1, %s1672_s27 }
   0xb   : > { %p47_p0 = scmp.ge.s32.totalorder %s45_s16, 2  ;;  %p372_p1 = scmp.ne.s32.totalorder %s1672_s27, %s1668_s26 }
   0xc   : > { %p373_p2 = scmp.eq.s32.totalorder %s1414_s14, 1  ;;  %p378_p3 = scmp.ne.s32.totalorder %s1668_s26, %s1664_s25 }
   0xd   : > { %s2108_s16 = smov (%p47_p0, %s45_s16), 0  ;;  %p379_p5 = scmp.eq.s32.totalorder %s1415_s15, 1 }
   0xe   : > { %2094 = sst [smem:[#allocation8_spill]] %s2108_s16  ;;  %p1803_p4 = por %p373_p2, %p372_p1 }
   0xf   : > { %s357_s19 = ssub.s32 %s1680_s29, %s2108_s16  ;;  %p1419_p6 = scmp.ge.s32.totalorder %s1684_s30, 1 }
  0x10   : > { %p360_p7 = scmp.eq.s32.totalorder %s357_s19, 0  ;;  %p1810_p8 = por %p379_p5, %p378_p3 }
  0x11   : > { %p474_p9 = scmp.lt.s32.totalorder %s1684_s30, 3 }
  0x12   : > { %s1816_s21 = scalar_select %p360_p7, %s1672_s27, %s362_s17  }
  0x13   : > { %p475_p10 = pnand %p1419_p6, %p474_p9 }
  0x14   : > { %p551_p11 = scmp.lt.s32.totalorder (!%p475_p10), %s1676_s28, 1  ;;  %s2097_s2 = sld [smem:[#allocation11_spill]] (!%p475_p10) }
  0x15   : > { %478 = sbr.rel (%p475_p10) target bundleno = 1580 (0x62c), region = 72  ;;  %s2098_s1 = sld [smem:[#allocation10_spill]] (!%p475_p10) }
  0x16   : > { %s2099_s3 = sld [smem:[#allocation12_spill]] (!%p475_p10)  ;;  %s1690_s17 = smov (!%p475_p10), 8  }
  0x17   : > { %s1691_s24 = smov (!%p475_p10), 24   ;;  %s2100_s0 = sld [smem:[#allocation9_spill]] (!%p475_p10) }
  0x1a   : > { %s1820_s22 = scalar_select %p551_p11, %s1676_s28, 1  ;;  %vm603_vm0 = vcmask 64512   ;;  %v721_v18 = vlaneseq  ;;  %v1856_v21 = vld [vmem:[%s2079_s4] sm:$0xff]  ;;  %vm594_vm1 = vcmask 7168   ;;  %v1686_v25 = vmov -inf  }
  0x1b   : > { %596 = vst.msk [vmem:[#allocation2 + $0x8] sm:$0xff] %vm594_vm1, %v1686_v25  ;;  %v1687_v44 = vmov 0   ;;  %v1688_v45 = vmov 0.0   ;;  %vm864_vm3 = vcmask 1043456   ;;  %vm1003_vm4 = vcmask 130048  }
  0x1c   : > { %s1823_s23 = sshll.u32 %s1820_s22, 5  ;;  %v1849_v19 = vshrl.u32 %v721_v18, 7  ;;  %v1851_v20 = vand.u32 127, %v721_v18  ;;  %595 = vst.msk [vmem:[#allocation2] sm:$0xff] %vm594_vm1, %v1686_v25  ;;  %1570 = vset.pattern.permute.xlu0 %v1687_v44  ;;  %1568 = vset.pattern.permute.xlu1 %v1687_v44  ;;  %vm1005_vm5 = vcmask 195584   ;;  %vm1028_vm6 = vcmask 261120  }
  0x1d   : > { %s1829_s15 = scalar_lea.vmem %s2097_s2, %s1823_s23  ;;  %s1835_s16 = scalar_lea.vmem %s2098_s1, %s1823_s23  ;;  %597 = vst.msk [vmem:[#allocation2 + $0x10] sm:$0xff] %vm594_vm1, %v1686_v25  ;;  %1569 = vset.pattern.permute.xlu2 %v1687_v44 }
  0x1e   : > { %v628_v0 = vld [vmem:[%s1829_s15 + $0x8] sm:$0xff]  ;;  %v629_v1 = vld [vmem:[%s1829_s15 + $0x10] sm:$0xff]  ;;  %v630_v6 = vld [vmem:[%s1829_s15 + $0x18] sm:$0xff]  ;;  %vm729_vm2 = vcmp.ge.s32.totalorder %v1849_v19, %v1851_v20  ;;  %598 = vst.msk [vmem:[#allocation2 + $0x18] sm:$0xff] %vm594_vm1, %v1686_v25  ;;  %s1930_s19 = scalar_lea.vmem %s2099_s3, %s1823_s23  ;;  %s1689_s23 = smov 16  }
  0x1f   : > { %v616_v2 = vld [vmem:[%s1835_s16 + $0x8] sm:$0xff]  ;;  %v632_v3 = vpack.c.bf16 %v628_v0, %v628_v0  ;;  %v633_v4 = vpack.c.bf16 %v629_v1, %v629_v1  ;;  %v617_v5 = vld [vmem:[%s1835_s16 + $0x10] sm:$0xff]  ;;  %v634_v7 = vpack.c.bf16 %v630_v6, %v630_v6  ;;  %v618_v15 = vld [vmem:[%s1835_s16 + $0x18] sm:$0xff]  ;;  %602 = vst.msk [vmem:[#allocation3 + $0x18] sm:$0xff] %vm594_vm1, %v1688_v45 }
  0x20   : > { %v620_v10 = vmul.f32 0.35355338, %v616_v2  ;;  %v621_v11 = vmul.f32 0.35355338, %v617_v5  ;;  %v622_v16 = vmul.f32 0.35355338, %v618_v15 }
  0x21   : > { %v668_v8 = vsel %vm603_vm0, %v632_v3, 0  ;;  %v687_v9 = vsel %vm603_vm0, %v633_v4, 0  ;;  %v706_v12 = vsel %vm603_vm0, %v634_v7, 0  ;;  %v627_v22 = vld [vmem:[%s1829_s15] sm:$0xff]  ;;  %599 = vst.msk [vmem:[#allocation3] sm:$0xff] %vm594_vm1, %v1688_v45  ;;  %v638_v63 = vld [vmem:[%s1930_s19 + $0x18] sm:$0xff] }
  0x22   : > { %677 = vmatpush.bf16.xpose.msra.mxu1 %v668_v8  ;;  %696 = vmatpush.bf16.xpose.msra.mxu3 %v687_v9  ;;  %v624_v13 = vpack.c.bf16 %v620_v10, %v620_v10  ;;  %v625_v14 = vpack.c.bf16 %v621_v11, %v621_v11  ;;  %v626_v17 = vpack.c.bf16 %v622_v16, %v622_v16  ;;  %v615_v23 = vld [vmem:[%s1835_s16] sm:$0xff]  ;;  %v1897_v46 = vld [vmem:[#allocation2 + $0x8] sm:$0xff]  ;;  %v637_v5 = vld [vmem:[%s1930_s19 + $0x10] sm:$0xff] }
  0x23   : > { %v631_v24 = vpack.c.bf16 %v627_v22, %v627_v22  ;;  %v619_v29 = vmul.f32 0.35355338, %v615_v23  ;;  %600 = vst.msk [vmem:[#allocation3 + $0x8] sm:$0xff] %vm594_vm1, %v1688_v45  ;;  %v642_v0 = vpack.c.bf16 %v638_v63, %v638_v63  ;;  %v636_v1 = vld [vmem:[%s1930_s19 + $0x8] sm:$0xff]  ;;  %v641_v6 = vpack.c.bf16 %v637_v5, %v637_v5  ;;  %v736_v25 = vld [vmem:[#allocation2] sm:$0xff] }
  0x24   : > { %601 = vst.msk [vmem:[#allocation3 + $0x10] sm:$0xff] %vm594_vm1, %v1688_v45  ;;  %v1907_v50 = vld [vmem:[#allocation2 + $0x10] sm:$0xff]  ;;  %v640_v3 = vpack.c.bf16 %v636_v1, %v636_v1 }
  0x25   : > { %v649_v28 = vsel %vm603_vm0, %v631_v24, 0  ;;  %v623_v32 = vpack.c.bf16 %v619_v29, %v619_v29  ;;  %604 = vst.msk [vmem:[#allocation4] sm:$0xff] %vm603_vm0, %v1688_v45  ;;  %v739_v55 = vld [vmem:[#allocation2 + $0x18] sm:$0xff]  ;;  %v923_v2 = vsel %vm864_vm3, %v642_v0, 0  ;;  %v904_v7 = vsel %vm864_vm3, %v641_v6, 0 }
  0x26   : > { %658 = vmatpush.bf16.xpose.msra.mxu0 %v649_v28  ;;  %605 = vst.msk [vmem:[#allocation4 + $0x8] sm:$0xff] %vm603_vm0, %v1688_v45  ;;  %v885_v4 = vsel %vm864_vm3, %v640_v3, 0  ;;  %913 = vmatpush.bf16.msra.mxu2 %v904_v7 }
  0x27   : > { %606 = vst.msk [vmem:[#allocation4 + $0x10] sm:$0xff] %vm603_vm0, %v1688_v45 }
  0x28   : > { %607 = vst.msk [vmem:[#allocation4 + $0x18] sm:$0xff] %vm603_vm0, %v1688_v45 }
  0x29   : > { %1429 = vmatmul.msk.bf16.vlgmr.msra.gmra.mxu1 %vm603_vm0, %v624_v13  ;;  %1430 = vmatmul.msk.bf16.vlgmr.msra.gmra.mxu3 %vm603_vm0, %v625_v14 }
  0x2a   : > { %715 = vmatpush.bf16.xpose.msrb.mxu3 %v706_v12  ;;  %894 = vmatpush.bf16.msrb.mxu1 %v885_v4  ;;  %v801_v3 = vld [vmem:[#allocation3 + $0x8] sm:$0xff] }
  0x2d   : > { %1428 = vmatmul.msk.bf16.vlgmr.msra.gmra.mxu0 %vm603_vm0, %v623_v32 }
  0x32   : > { %932 = vmatpush.bf16.msra.mxu3 %v923_v2 }
  0x39   : > { %1431 = vmatmul.msk.bf16.vlgmr.msrb.gmra.mxu3 %vm603_vm0, %v626_v17 }
  0xa6   : > { %v679_v26 = vpop.f32.mrf.mxu1 }
  0xa7   : > { %v680_v27 = vadd.f32 %v679_v26, %v1856_v21 }
  0xa9   : > { %v1871_v30 = vsel %vm729_vm2, %v680_v27, -1e+09 }
  0xaa   : > { %v743_v31 = vsel %vm603_vm0, %v1871_v30, -inf  ;;  %v660_v54 = vpop.f32.mrf.mxu0 }
  0xab   : > { %744 = vmax.xlane.f32.xlu1 %v743_v31  ;;  %v661_v60 = vadd.f32 %v660_v54, %v1856_v21  ;;  %v635_v54 = vld [vmem:[%s1930_s19] sm:$0xff] }
  0xac   : > { %v698_v33 = vpop.f32.mrf.mxu3 }
  0xad   : > { %v699_v34 = vadd.f32 %v698_v33, %v1856_v21  ;;  %v1922_v61 = vsel %vm729_vm2, %v661_v60, -1e+09  ;;  %v803_v33 = vld [vmem:[#allocation3 + $0x18] sm:$0xff] }
  0xae   : > { %v681_v35 = vpop.f32.mrf.mxu1  ;;  %v740_v62 = vsel %vm603_vm0, %v1922_v61, -inf }
  0xaf   : > { %v1879_v36 = vsel %vm729_vm2, %v699_v34, -1e+09 }
  0xb0   : > { %v746_v37 = vsel %vm603_vm0, %v1879_v36, -inf }
  0xb1   : > { %747 = vmax.xlane.f32.xlu0 %v746_v37 }
  0xb2   : > { %v662_v57 = vpop.f32.mrf.mxu0 }
  0xb4   : > { %v700_v38 = vpop.f32.mrf.mxu3 }
  0xb5   : > { %v802_v38 = vld [vmem:[#allocation3 + $0x10] sm:$0xff] }
  0xbc   : > { %v717_v39 = vpop.f32.mrf.mxu3 }
  0xbd   : > { %v718_v40 = vadd.f32 %v717_v39, %v1856_v21 }
  0xbf   : > { %v735_v41 = vsel %vm729_vm2, %v718_v40, -1e+09 }
  0xc0   : > { %v749_v42 = vsel %vm603_vm0, %v735_v41, -inf }
  0xc1   : > { %750 = vmax.xlane.f32.xlu0 %v749_v42 }
  0xc4   : > { %v719_v43 = vpop.f32.mrf.mxu3 }
 0x11e   : > { %v745_v47 = vpop.xlane.xlu1 %744 }
 0x11f   : > { %v1900_v48 = vmax.f32 %v1897_v46, %v745_v47 }
 0x121   : > { %v757_v49 = vsub.f32 %v1897_v46, %v1900_v48  ;;  %947 = vst.msk [vmem:[#allocation2 + $0x8] sm:$0xff] %vm594_vm1, %v1900_v48  ;;  %775 = vperm.xlu0 %1570, %v1900_v48  }
 0x123   : > { %v762_v1 = vmul.f32 1.442695, %v757_v49 }
 0x124   : > { %v748_v51 = vpop.xlane.xlu0 %747 }
 0x125   : > { %v1910_v52 = vmax.f32 %v1907_v50, %v748_v51 }
 0x127   : > { %v758_v53 = vsub.f32 %v1907_v50, %v1910_v52  ;;  %948 = vst.msk [vmem:[#allocation2 + $0x10] sm:$0xff] %vm594_vm1, %v1910_v52  ;;  %780 = vperm.xlu1 %1568, %v1910_v52  }
 0x129   : > { %v764_v31 = vmul.f32 1.442695, %v758_v53 }
 0x134   : > { %v751_v56 = vpop.xlane.xlu0 %750 }
 0x135   : > { %v755_v58 = vmax.f32 %v739_v55, %v751_v56 }
 0x137   : > { %v759_v59 = vsub.f32 %v739_v55, %v755_v58  ;;  %949 = vst.msk [vmem:[#allocation2 + $0x18] sm:$0xff] %vm594_vm1, %v755_v58  ;;  %785 = vperm.xlu2 %1569, %v755_v58   ;;  %v639_v55 = vpack.c.bf16 %v635_v54, %v635_v54 }
 0x139   : > { %v866_v56 = vsel %vm864_vm3, %v639_v55, 0  ;;  %v1571_v55 = vld [vmem:[%s2081_s6] ss:$0 sm:$0xff] }
 0x13a   : > { %875 = vmatpush.bf16.msrb.mxu0 %v866_v56 }
 0x160   : > { %741 = vmax.xlane.f32.xlu2 %v740_v62 }
 0x191   : > { %v786_v8 = vpop.permute.xlu2 %785 }
 0x192   : > { %v791_v9 = vsub.f32 %v735_v41, %v786_v8 }
 0x193   : > { %v776_v10 = vpop.permute.xlu0 %775 }
 0x194   : > { %v798_v11 = vmul.f32 1.442695, %v791_v9  ;;  %v789_v12 = vsub.f32 %v1871_v30, %v776_v10  ;;  %v766_v30 = vmul.f32 1.442695, %v759_v59  ;;  %v831_v9 = vld [vmem:[#allocation4 + $0x10] sm:$0xff] }
 0x196   : > { %1576 = vpow2.f32 %v798_v11  ;;  %v794_v13 = vmul.f32 1.442695, %v789_v12 }
 0x198   : > { %1578 = vpow2.f32 %v794_v13 }
 0x199   : > { %v781_v14 = vpop.permute.xlu1 %780 }
 0x19a   : > { %v790_v15 = vsub.f32 %v1879_v36, %v781_v14  ;;  %v800_v14 = vld [vmem:[#allocation3] sm:$0xff] }
 0x19c   : > { %v1577_v16 = vpop.eup %1576  ;;  %v796_v17 = vmul.f32 1.442695, %v790_v15 }
 0x19d   : > { %v860_v18 = vpack.c.bf16 %v1577_v16, %v1577_v16  ;;  %v817_v19 = vsel %vm603_vm0, %v1577_v16, 0.0 }
 0x19e   : > { %v1579_v20 = vpop.eup %1578  ;;  %1580 = vpow2.f32 %v796_v17  ;;  %818 = vadd.xlane.f32.xlu0 %v817_v19  ;;  %v829_v19 = vld [vmem:[#allocation4] sm:$0xff] }
 0x19f   : > { %1435 = vmatmul.msk.bf16.vlgmr.msra.gmra.mxu3 %vm603_vm0, %v860_v18  ;;  %v858_v21 = vpack.c.bf16 %v1579_v20, %v1579_v20  ;;  %v811_v29 = vsel %vm603_vm0, %v1579_v20, 0.0  ;;  %1582 = vpow2.f32 %v766_v30  ;;  %v830_v18 = vld [vmem:[#allocation4 + $0x8] sm:$0xff] }
 0x1a0   : > { %1584 = vpow2.f32 %v764_v31 }
 0x1a1   : > { %1433 = vmatmul.msk.bf16.vlgmr.msrb.gmra.mxu1 %vm603_vm0, %v858_v21 }
 0x1a4   : > { %v1581_v22 = vpop.eup %1580 }
 0x1a5   : > { %v814_v23 = vsel %vm603_vm0, %v1581_v22, 0.0  ;;  %v859_v24 = vpack.c.bf16 %v1581_v22, %v1581_v22  ;;  %v1583_v32 = vpop.eup %1582 }
 0x1a6   : > { %815 = vadd.xlane.f32.xlu2 %v814_v23  ;;  %v807_v34 = vmul.f32 %v1583_v32, %v803_v33  ;;  %v1585_v37 = vpop.eup %1584 }
 0x1a7   : > { %1434 = vmatmul.msk.bf16.vlgmr.msra.gmra.mxu2 %vm603_vm0, %v859_v24  ;;  %v806_v40 = vmul.f32 %v1585_v37, %v802_v38 }
 0x1d3   : > { %v742_v26 = vpop.xlane.xlu2 %741 }
 0x1d4   : > { %v752_v27 = vmax.f32 %v736_v25, %v742_v26 }
 0x1d6   : > { %v756_v28 = vsub.f32 %v736_v25, %v752_v27  ;;  %946 = vst.msk [vmem:[#allocation2] sm:$0xff] %vm594_vm1, %v752_v27  ;;  %770 = vperm.xlu1 %1568, %v752_v27  }
 0x1d8   : > { %v760_v39 = vmul.f32 1.442695, %v756_v28  ;;  %v832_v28 = vld [vmem:[#allocation4 + $0x18] sm:$0xff] }
 0x1da   : > { %1586 = vpow2.f32 %v760_v39 }
 0x1e0   : > { %v1587_v44 = vpop.eup %1586 }
 0x1e1   : > { %v804_v15 = vmul.f32 %v1587_v44, %v800_v14 }
 0x200   : > { %812 = vadd.xlane.f32.xlu1 %v811_v29 }
 0x211   : > { %v819_v35 = vpop.xlane.xlu0 %818 }
 0x212   : > { %v823_v36 = vadd.f32 %v819_v35, %v807_v34 }
 0x214   : > { %828 = vst.msk [vmem:[#allocation3 + $0x18] sm:$0xff] %vm594_vm1, %v823_v36 }
 0x219   : > { %845 = vperm.xlu1 %1568, %v1585_v37   ;;  %v816_v41 = vpop.xlane.xlu2 %815 }
 0x21a   : > { %v822_v42 = vadd.f32 %v816_v41, %v806_v40  ;;  %v1495_v40 = vld [vmem:[%s2080_s5 + $0x8] sm:$0xff]  ;;  %v1494_v41 = vld [vmem:[%s2080_s5] sm:$0xff] }
 0x21b   : > { %v960_v7 = vld [vmem:[#allocation3 + $0x18] sm:$0xff]  ;;  %1038 = vmatpush.bf16.msra.mxu0 %v1495_v40 }
 0x21c   : > { %827 = vst.msk [vmem:[#allocation3 + $0x10] sm:$0xff] %vm594_vm1, %v822_v42 }
 0x21e   : > { %v1952_v43 = vpop.f32.mrf.mxu1 }
 0x21f   : > { %1039 = vmatpush.bf16.msra.mxu0 %v1494_v41  ;;  %v1500_v41 = vld [vmem:[%s2086_s11 + $0x10] sm:$0xff] }
 0x221   : > { %835 = vperm.xlu1 %1568, %v1587_v44  }
 0x222   : > { %v1954_v45 = vpop.f32.mrf.mxu3 }
 0x223   : > { %v959_v47 = vld [vmem:[#allocation3 + $0x10] sm:$0xff] }
 0x224   : > { %1588 = vrcp.f32 %v959_v47 }
 0x226   : > { %v898_v50 = vpop.f32.mrf.mxu1 }
 0x22a   : > { %v1589_v51 = vpop.eup %1588  ;;  %v915_v52 = vpop.f32.mrf.mxu2 }
 0x22b   : > { %v936_v53 = vpop.f32.mrf.mxu3  ;;  %977 = vperm.xlu0 %1570, %v1589_v51  }
 0x232   : > { %v917_v57 = vpop.f32.mrf.mxu2 }
 0x248   : > { %v771_v58 = vpop.permute.xlu1 %770 }
 0x249   : > { %v788_v59 = vsub.f32 %v1922_v61, %v771_v58 }
 0x24b   : > { %v792_v60 = vmul.f32 1.442695, %v788_v59 }
 0x24d   : > { %1590 = vpow2.f32 %v792_v60 }
 0x24e   : > { %1592 = vpow2.f32 %v762_v1 }
 0x253   : > { %v1591_v62 = vpop.eup %1590 }
 0x254   : > { %v808_v63 = vsel %vm603_vm0, %v1591_v62, 0.0  ;;  %v857_v0 = vpack.c.bf16 %v1591_v62, %v1591_v62  ;;  %v1593_v2 = vpop.eup %1592 }
 0x255   : > { %809 = vadd.xlane.f32.xlu2 %v808_v63  ;;  %v805_v4 = vmul.f32 %v1593_v2, %v801_v3  ;;  %v1692_v63 = vmov 32.0  }
 0x256   : > { %1432 = vmatmul.msk.bf16.vlgmr.msrb.gmra.mxu0 %vm603_vm0, %v857_v0 }
 0x26d   : > { %840 = vperm.xlu2 %1569, %v1593_v2  }
 0x273   : > { %v813_v5 = vpop.xlane.xlu1 %812 }
 0x274   : > { %v821_v61 = vadd.f32 %v813_v5, %v805_v4 }
 0x275   : > { %850 = vperm.xlu2 %1569, %v1583_v32  }
 0x276   : > { %826 = vst.msk [vmem:[#allocation3 + $0x8] sm:$0xff] %vm594_vm1, %v821_v61 }
 0x27d   : > { %v958_v6 = vld [vmem:[#allocation3 + $0x8] sm:$0xff] }
 0x27e   : > { %1594 = vrcp.f32 %v958_v6 }
 0x27f   : > { %1596 = vrcp.f32 %v960_v7 }
 0x284   : > { %v1595_v8 = vpop.eup %1594 }
 0x285   : > { %972 = vperm.xlu2 %1569, %v1595_v8   ;;  %v1597_v46 = vpop.eup %1596 }
 0x28b   : > { %v846_v10 = vpop.permute.xlu1 %845 }
 0x28c   : > { %v855_v48 = vmul.f32 %v846_v10, %v831_v9  ;;  %v1497_v10 = vld [vmem:[%s2084_s9 + $0x8] sm:$0xff] }
 0x28d   : > { %982 = vperm.xlu2 %1569, %v1597_v46   ;;  %1116 = vmatpush.bf16.msra.mxu1 %v1497_v10  ;;  %v1496_v46 = vld [vmem:[%s2084_s9] sm:$0xff] }
 0x28e   : > { %v940_v49 = vadd.f32 %v915_v52, %v855_v48 }
 0x290   : > { %944 = vst.msk [vmem:[#allocation4 + $0x10] sm:$0xff] %vm603_vm0, %v940_v49 }
 0x291   : > { %1117 = vmatpush.bf16.msra.mxu1 %v1496_v46 }
 0x293   : > { %v836_v20 = vpop.permute.xlu1 %835 }
 0x294   : > { %v853_v23 = vmul.f32 %v836_v20, %v829_v19 }
 0x297   : > { %v955_v11 = vld [vmem:[#allocation4 + $0x10] sm:$0xff] }
 0x29d   : > { %v978_v12 = vpop.permute.xlu0 %977 }
 0x29e   : > { %v987_v13 = vmul.f32 %v978_v12, %v955_v11 }
 0x2a0   : > { %994 = vrot.lane.b32.xlu0 %v987_v13, %s1689_s23  ;;  %s1421_s23 = sshll.u32 %s1820_s22, 3 }
 0x2a1   : > { %s557_s14 = scalar_lea.vmem %s2100_s0, %s1421_s23  ;;  %s548_s23 = sand.u32 1, %s1668_s26  }
 0x2a2   : > { %v1045_v57 = vld [vmem:[%s557_s14] sm:$0xff] }
 0x2c8   : > { %v810_v16 = vpop.xlane.xlu2 %809 }
 0x2c9   : > { %v820_v17 = vadd.f32 %v810_v16, %v804_v15 }
 0x2cb   : > { %825 = vst.msk [vmem:[#allocation3] sm:$0xff] %vm594_vm1, %v820_v17 }
 0x2d0   : > { %v841_v21 = vpop.permute.xlu2 %840 }
 0x2d1   : > { %v854_v22 = vmul.f32 %v841_v21, %v830_v18  ;;  %v1572_v18 = vld [vmem:[%s2082_s7] ss:$0 sm:$0xff] }
 0x2d2   : > { %v957_v24 = vld [vmem:[#allocation3] sm:$0xff] }
 0x2d3   : > { %v939_v25 = vadd.f32 %v1952_v43, %v854_v22  ;;  %v877_v26 = vpop.f32.mrf.mxu0  ;;  %1598 = vrcp.f32 %v957_v24  ;;  %v1573_v21 = vld [vmem:[%s2083_s8] ss:$0 sm:$0xff] }
 0x2d4   : > { %v938_v27 = vadd.f32 %v877_v26, %v853_v23  ;;  %1600 = vrcp.f32 %v1692_v63  ;;  %v1504_v26 = vld [vmem:[%s2086_s11 + $0x30] sm:$0xff] }
 0x2d5   : > { %943 = vst.msk [vmem:[#allocation4 + $0x8] sm:$0xff] %vm603_vm0, %v939_v25  ;;  %v1505_v25 = vld [vmem:[%s2086_s11 + $0x38] sm:$0xff] }
 0x2d6   : > { %942 = vst.msk [vmem:[#allocation4] sm:$0xff] %vm603_vm0, %v938_v27  ;;  %1236 = vmatpush.bf16.msrb.mxu2 %v1505_v25  ;;  %v1574_v27 = vld [vmem:[%s2085_s10] ss:$0 sm:$0xff] }
 0x2d8   : > { %v851_v29 = vpop.permute.xlu2 %850 }
 0x2d9   : > { %v1599_v30 = vpop.eup %1598  ;;  %v856_v31 = vmul.f32 %v851_v29, %v832_v28  ;;  %v1503_v29 = vld [vmem:[%s2086_s11 + $0x28] sm:$0xff] }
 0x2da   : > { %967 = vperm.xlu2 %1569, %v1599_v30   ;;  %v1601_v0 = vpop.eup %1600  ;;  %1237 = vmatpush.bf16.msrb.mxu2 %v1504_v26 }
 0x2db   : > { %v941_v32 = vadd.f32 %v1954_v45, %v856_v31  ;;  %v879_v33 = vpop.f32.mrf.mxu0  ;;  %v1053_v1 = vmul.f32 32.0, %v1601_v0  ;;  %vm1057_vm7 = vweird.f32 %v1601_v0 }
 0x2dc   : > { %v954_v34 = vld [vmem:[#allocation4 + $0x8] sm:$0xff] }
 0x2dd   : > { %945 = vst.msk [vmem:[#allocation4 + $0x18] sm:$0xff] %vm603_vm0, %v941_v32  ;;  %v953_v43 = vld [vmem:[#allocation4] sm:$0xff]  ;;  %v1054_v2 = vsub.f32 1.0, %v1053_v1 }
 0x2de   : > { %1238 = vmatpush.bf16.msrb.mxu2 %v1503_v29  ;;  %v1502_v32 = vld [vmem:[%s2086_s11 + $0x20] sm:$0xff] }
 0x2df   : > { %v1055_v3 = vmul.f32 %v1601_v0, %v1054_v2 }
 0x2e0   : > { %v973_v35 = vpop.permute.xlu2 %972 }
 0x2e1   : > { %v986_v36 = vmul.f32 %v973_v35, %v954_v34  ;;  %v1056_v4 = vadd.f32 %v1601_v0, %v1055_v3 }
 0x2e2   : > { %1239 = vmatpush.bf16.msrb.mxu2 %v1502_v32 }
 0x2e3   : > { %990 = vrot.lane.b32.xlu1 %v986_v36, %s1690_s17  ;;  %v1058_v5 = vsel %vm1057_vm7, %v1601_v0, %v1056_v4  ;;  %v1501_v36 = vld [vmem:[%s2086_s11 + $0x18] sm:$0xff]  ;;  %s1420_s17 = sshll.u32 %s548_s23, 3 }
 0x2e4   : > { %v956_v37 = vld [vmem:[#allocation4 + $0x18] sm:$0xff]  ;;  %s550_s0 = scalar_lea.vmem [#allocation5], %s1420_s17  ;;  %s1626_s17 = scalar_lea.hbm %s2088_s13, 16 }
 0x2e5   : > { %s1265_s1 = sshll.u32 %s550_s0, 4  ;;  %s1266_s1 = int_to_ptr.vmem [resolvable:$true] %s1265_s1 }
 0x2e6   : > { %1240 = vmatpush.bf16.msrb.mxu2 %v1501_v36 }
 0x2e8   : > { %v983_v38 = vpop.permute.xlu2 %982 }
 0x2e9   : > { %v988_v39 = vmul.f32 %v983_v38, %v956_v37 }
 0x2ea   : > { %1241 = vmatpush.bf16.msrb.mxu2 %v1500_v41 }
 0x2eb   : > { %998 = vrot.lane.b32.xlu2 %v988_v39, %s1691_s24  ;;  %s1488_s24 = sshll.u32 %s1676_s28, 3  ;;  %s1252_s28 = scalar_lea.sflag [#allocation6], %s548_s23 }
 0x2ec   : > { %s1263_s19 = scalar_lea.hbm %s2088_s13, %s1488_s24 }
 0x2ed   : > { %s1267_s2 = sshll.u32 %s1263_s19, 4  ;;  %s1268_s2 = int_to_ptr.hbm [resolvable:$true] %s1267_s2 }
 0x2ee   : > { %s1620_s3 = sshra.s32 %s1268_s2, 4  ;;  %s1621_s3 = int_to_ptr.hbm [resolvable:$true] %s1620_s3 }
 0x2ef   : > { %s1622_s14 = scalar_lea.hbm %s1621_s3, 8  ;;  %p1627_p1 = scmp.lt.s32.totalorder %s1621_s3, %s2088_s13 }
 0x2f0   : > { %p1623_p12 = scmp.ne.s32.totalorder %s1621_s3, %s1622_s14  ;;  %p1628_p2 = scmp.lt.s32.totalorder %s1626_s17, %s1622_s14 }
 0x2f2   : > { %p1624_p13 = pnand %p1623_p12, %p1803_p4  ;;  %p1629_p3 = por %p1628_p2, %p1627_p1 }
 0x2f4   : > { %p1625_p0 = pneg %p1624_p13 }
 0x2f6   : > { %p1630_p5 = pnand %p1629_p3, %p1625_p0 }
 0x312   : > { %v995_v47 = vpop.permute.xlu0 %994 }
 0x334   : > { %v968_v42 = vpop.permute.xlu2 %967 }
 0x335   : > { %v985_v44 = vmul.f32 %v968_v42, %v953_v43 }
 0x345   : > { %v999_v51 = vpop.permute.xlu2 %998 }
 0x355   : > { %v991_v45 = vpop.permute.xlu1 %990 }
 0x356   : > { %v1002_v50 = vsel %vm603_vm0, %v985_v44, %v991_v45  ;;  %v1499_v44 = vld [vmem:[%s2086_s11 + $0x8] sm:$0xff] }
 0x357   : > { %v1004_v52 = vsel %vm1003_vm4, %v1002_v50, %v995_v47  ;;  %1242 = vmatpush.bf16.msrb.mxu2 %v1499_v44 }
 0x358   : > { %v1006_v53 = vsel %vm1005_vm5, %v1004_v52, %v999_v51  ;;  %v1498_v51 = vld [vmem:[%s2086_s11] sm:$0xff] }
 0x359   : > { %v1007_v54 = vpack.c.bf16 %v1006_v53, %v1006_v53 }
 0x35b   : > { %1444 = vmatmul.msk.bf16.vlgmr.msra.gmra.mxu0 %vm1028_vm6, %v1007_v54  ;;  %1243 = vmatpush.bf16.msrb.mxu2 %v1498_v51 }
 0x3d8   : > { %v1041_v56 = vpop.f32.mrf.mxu0 }
 0x3d9   : > { %v1042_v58 = vadd.f32 %v1571_v55, %v1041_v56 }
 0x3db   : > { %v1987_v59 = vadd.f32 %v1045_v57, %v1042_v58 }
 0x3dd   : > { %v1049_v60 = vsel %vm1028_vm6, %v1987_v59, 0.0 }
 0x3de   : > { %1050 = vadd.xlane.f32.xlu1 %v1049_v60 }
 0x3e0   : > { %v1043_v62 = vpop.f32.mrf.mxu0 }
 0x451   : > { %v1051_v61 = vpop.xlane.xlu1 %1050 }
 0x452   : > { %v1059_v6 = vmul.f32 %v1058_v5, %v1051_v61 }
 0x454   : > { %v1060_v7 = vsub.f32 %v1987_v59, %v1059_v6 }
 0x456   : > { %v1061_v8 = vmul.f32 %v1060_v7, %v1060_v7 }
 0x458   : > { %v1062_v9 = vsel %vm1028_vm6, %v1061_v8, 0.0 }
 0x459   : > { %1063 = vadd.xlane.f32.xlu0 %v1062_v9 }
 0x4cc   : > { %v1064_v48 = vpop.xlane.xlu0 %1063 }
 0x4cd   : > { %v1065_v49 = vmul.f32 %v1064_v48, %v1058_v5 }
 0x4cf   : > { %v1066_v11 = vadd.f32 1e-05, %v1065_v49 }
 0x4d1   : > { %1602 = vrsqrt.f32 %v1066_v11  ;;  %vm1073_vm9 = vweird.f32 %v1066_v11 }
 0x4d7   : > { %v1603_v12 = vpop.eup %1602 }
 0x4d8   : > { %v1068_v13 = vmul.f32 %v1603_v12, %v1066_v11  ;;  %vm1074_vm8 = vweird.f32 %v1603_v12 }
 0x4d9   : > { %vm1075_vm10 = vmor %vm1073_vm9, %vm1074_vm8 }
 0x4da   : > { %v1069_v14 = vmul.f32 %v1603_v12, %v1068_v13 }
 0x4dc   : > { %v1070_v15 = vmul.f32 0.5, %v1069_v14  ;;  %v1575_v14 = vld [vmem:[%s2087_s12] ss:$0 sm:$0xff] }
 0x4de   : > { %v1071_v16 = vsub.f32 1.5, %v1070_v15 }
 0x4e0   : > { %v1072_v17 = vmul.f32 %v1603_v12, %v1071_v16 }
 0x4e2   : > { %v1076_v19 = vsel %vm1075_vm10, %v1603_v12, %v1072_v17 }
 0x4e3   : > { %v1077_v20 = vmul.f32 %v1076_v19, %v1060_v7 }
 0x4e5   : > { %v1081_v22 = vmul.f32 %v1572_v18, %v1077_v20 }
 0x4e7   : > { %v1085_v23 = vadd.f32 %v1573_v21, %v1081_v22 }
 0x4e9   : > { %v1086_v24 = vpack.c.bf16 %v1085_v23, %v1085_v23 }
 0x4eb   : > { %1453 = vmatmul.msk.bf16.vlgmr.msra.gmra.mxu1 %vm1028_vm6, %v1086_v24 }
 0x568   : > { %v1119_v28 = vpop.f32.mrf.mxu1 }
 0x569   : > { %v1120_v30 = vadd.f32 %v1574_v27, %v1119_v28 }
 0x56b   : > { %v1124_v31 = vmul.f32 0.70710677, %v1120_v30  ;;  %v1123_v49 = vmul.f32 0.5, %v1120_v30 }
 0x56d   : > { %v1125_v33 = vmul.f32 %v1124_v31, %v1124_v31 }
 0x56f   : > { %v1126_v34 = vmin.f32 %v1125_v33, 16.0 }
 0x570   : > { %v1121_v35 = vpop.f32.mrf.mxu1 }
 0x571   : > { %v1127_v37 = vmul.f32 2.1237322e-06, %v1126_v34  ;;  %v1138_v38 = vmul.f32 3.8918573e-05, %v1126_v34 }
 0x573   : > { %v1128_v39 = vadd.f32 0.00028619796, %v1127_v37  ;;  %v1139_v40 = vadd.f32 0.001143296, %v1138_v38 }
 0x575   : > { %v1129_v42 = vmul.f32 %v1128_v39, %v1126_v34  ;;  %v1140_v43 = vmul.f32 %v1139_v40, %v1126_v34 }
 0x577   : > { %v1141_v45 = vadd.f32 0.014752088, %v1140_v43  ;;  %v1130_v47 = vadd.f32 0.0036580483, %v1129_v42 }
 0x579   : > { %v1142_v50 = vmul.f32 %v1141_v45, %v1126_v34  ;;  %v1131_v53 = vmul.f32 %v1130_v47, %v1126_v34 }
 0x57b   : > { %v1143_v52 = vadd.f32 0.112945676, %v1142_v50  ;;  %v1132_v56 = vadd.f32 0.05243302, %v1131_v53 }
 0x57d   : > { %v1144_v54 = vmul.f32 %v1143_v52, %v1126_v34  ;;  %v1133_v60 = vmul.f32 %v1132_v56, %v1126_v34 }
 0x57f   : > { %v1145_v55 = vadd.f32 0.4994258, %v1144_v54  ;;  %v1134_v62 = vadd.f32 0.18741608, %v1133_v60 }
 0x581   : > { %v1146_v57 = vmul.f32 %v1145_v55, %v1126_v34  ;;  %v1135_v0 = vmul.f32 %v1134_v62, %v1126_v34 }
 0x583   : > { %v1147_v58 = vadd.f32 1.0, %v1146_v57  ;;  %v1136_v4 = vadd.f32 1.1283791, %v1135_v0 }
 0x585   : > { %1604 = vrcp.f32 %v1147_v58  ;;  %v1159_v3 = vand.u32 2147483648, %v1147_v58  ;;  %v1157_v61 = vand.u32 2147483647, %v1147_v58  ;;  %vm1153_vm12 = vweird.f32 %v1147_v58 }
 0x586   : > { %v1137_v8 = vmul.f32 %v1136_v4, %v1124_v31 }
 0x587   : > { %v1160_v7 = vor.u32 1.1754944e-38, %v1159_v3  ;;  %vm1158_vm14 = vcmp.eq.f32.partialorder %v1157_v61, 8.507059e+37 }
 0x58b   : > { %v1605_v63 = vpop.eup %1604 }
 0x58c   : > { %v1149_v1 = vmul.f32 %v1605_v63, %v1147_v58  ;;  %vm1154_vm11 = vweird.f32 %v1605_v63 }
 0x58d   : > { %vm1155_vm13 = vmor %vm1153_vm12, %vm1154_vm11 }
 0x58e   : > { %v1150_v2 = vsub.f32 1.0, %v1149_v1 }
 0x590   : > { %v1151_v5 = vmul.f32 %v1605_v63, %v1150_v2 }
 0x592   : > { %v1152_v6 = vadd.f32 %v1605_v63, %v1151_v5 }
 0x594   : > { %v1156_v9 = vsel %vm1155_vm13, %v1605_v63, %v1152_v6 }
 0x595   : > { %v1161_v10 = vsel %vm1158_vm14, %v1160_v7, %v1156_v9 }
 0x596   : > { %v1162_v46 = vmul.f32 %v1161_v10, %v1137_v8 }
 0x598   : > { %v1454_v48 = vclamps-f32 %v1162_v46, 1.0 }
 0x59a   : > { %v1165_v11 = vadd.f32 1.0, %v1454_v48 }
 0x59c   : > { %v1166_v12 = vmul.f32 %v1165_v11, %v1123_v49 }
 0x59e   : > { %v1167_v13 = vpack.c.bf16 %v1166_v12, %v1166_v12 }
 0x5a0   : > { %1244 = vmatmul.bf16.vlgmr.msrb.gmra.mxu2 %v1167_v13 }
 0x623   : > { %v1245_v15 = vpop.f32.mrf.mxu2 }
 0x624   : > { %v1246_v16 = vadd.f32 %v1575_v14, %v1245_v15 }
 0x626   : > { %v1249_v17 = vadd.f32 %v1246_v16, %v1987_v59 }
 0x628   : > { %1250 = vst.msk [vmem:[%s550_s0] sm:$0xff] %vm1028_vm6, %v1249_v17 }
 0x629   : > { %1633 = shalt.err (!%p1630_p5)
}
 0x62a   : > { %1506 = dma.vmem_to_hbm [thread:$0]  (%p1803_p4), %s1266_s1, 128, %s1268_s2, %s1252_s28  }
 0x62b   : > { %v1247_v59 = vpop.f32.mrf.mxu2 }
 0x62c PF: > { %p1512_p6 = scmp.ge.s32.totalorder %s1684_s30, 2  ;;  %s1279_s0 = sand.u32 1, %s1664_s25  }
 0x62d   : > { %s1280_s23 = scalar_lea.sflag [#allocation6], %s1279_s0 }
 0x62e   : > { %p1509_p7 = pnand %p1512_p6, %p1810_p8 }
 0x630   : > { %p1510_p9 = pneg %p1509_p7 }
 0x632   : > { %1659 = dma.done.wait (%p1510_p9), %s1280_s23, 128  }
 0x633   : > { %1661 = vsyncadd (%p1510_p9), %s1280_s23, 4294967168  ;;  %s26_s30 = sadd.s32 1, %s1684_s30   ;;  %s2101_s1 = sld [smem:[#allocation8_spill]] }
 0x634   : > { %p23_p10 = scmp.ge.s32.totalorder %s26_s30, 4   ;;  %s2102_s25 = smov %s1668_s26 }
 0x635   : > { %s2103_s26 = smov %s1672_s27  ;;  %s2104_s27 = smov %s1816_s21 }
 0x636   : > { %s2105_s28 = smov %s1680_s29  ;;  %25 = sbr.rel (!%p23_p10) target bundleno = 9 (0x9), region = 131 }
 0x639   : > { %s2106_s29 = smov %s2101_s1 }
 0x63b   :  { %1286 = vsyncpa [#allocation6], 1 }
 0x63c   :  { %1288 = vsyncpa [#allocation6 + $0x1], 1 }

</bundles_post_ra>
